<compile_context>
chip_gen: v6e
topology: v6e:2x2x1
jax: 0.10.0
libtpu: 0.0.40
codegen_flags: <defaults>
</compile_context>

<pallas_src>
import functools

import jax
import jax.numpy as jnp
from jax import lax
from jax.experimental import pallas as pl
from jax.experimental.pallas import tpu as pltpu


# ----------------------------- tiling helpers ------------------------------ #

def _aligned_divisors(dim, align=128):
    """128-multiple divisors of dim (descending); falls back to [dim]."""
    divs = [d for d in range(align, dim + 1, align) if dim % d == 0]
    return sorted(divs, reverse=True) if divs else [dim]


def _usable_vmem_bytes():
    """~0.85x of the physical per-core VMEM (generation-aware cap)."""
    try:
        info = pltpu.get_tpu_info()
        cap = int(getattr(info, "vmem_capacity_bytes", 0)) or (64 << 20)
    except Exception:
        cap = 64 << 20  # conservative fallback: v7x per-TC VMEM
    return int(0.85 * cap)


def _vmem_budget(TS, TI, H, w_bytes, io_bytes):
    """Estimated VMEM footprint for one grid step (double-buffered pipeline)."""
    w_dbuf = 2 * (H * 2 * TI + TI * H) * w_bytes   # fused gate|up + down tiles, 2-buf
    xio = 2 * TS * H * io_bytes * 2                # x and out blocks, 2-buf
    acc = TS * H * 4                               # f32 accumulator scratch
    temps = 6 * TS * TI * 4                        # f32 gu/g/u/h (+ bf16 hw) temporaries
    rw = 2 * TS * 128 * 4                          # (TS,1) routing block (lane padded), 2-buf
    return w_dbuf + xio + acc + temps + rw + (2 << 20)


def _select_block_i(inter_dim, hidden_dim, w_bytes, usable):
    """TI only sizes the weight double-buffers; 256-512 is enough."""
    cap = max(int(0.30 * usable), 8 << 20)
    cands = _aligned_divisors(inter_dim)
    for ti in cands:
        if ti <= 512 and 6 * hidden_dim * ti * w_bytes <= cap:
            return ti
    return cands[-1]  # smallest available tile


def _select_block_s(S, H, TI, w_bytes, io_bytes, usable, *,
                    max_block_s=1024, user_block_s=None):
    """Largest S tile (the reuse knob) that fits the VMEM budget."""
    if user_block_s is not None:
        if S % user_block_s:
            raise ValueError(f"block_s={user_block_s} must divide S={S}")
        if _vmem_budget(user_block_s, TI, H, w_bytes, io_bytes) > usable:
            raise ValueError(
                f"block_s={user_block_s} with block_i={TI} does not fit the "
                f"VMEM budget ({usable} bytes usable)")
        return user_block_s
    cands = [t for t in _aligned_divisors(S) if t <= max_block_s]
    if not cands:
        cands = [_aligned_divisors(S)[-1]]
    multi = [t for t in cands if S // t >= 2]  # keep >=2 S tiles for megacore
    if multi:
        cands = multi
    for ts in cands:
        if _vmem_budget(ts, TI, H, w_bytes, io_bytes) <= usable:
            return ts
    raise ValueError(
        f"No sequence tile fits VMEM: S={S}, H={H}, block_i={TI}, "
        f"usable={usable} bytes. Reduce block_i or hidden sizes.")


# ----------------------------- Pallas kernel ------------------------------ #

def _dense_moe_kernel(x_ref, gu_ref, down_ref, rw_ref, out_ref, acc_ref, *,
                      block_i, mxu_dtype):
    """Grid = (S tiles [parallel], experts, I tiles [reduction, last])."""
    e = pl.program_id(1)
    it = pl.program_id(2)

    @pl.when((e == 0) & (it == 0))
    def _():
        acc_ref[...] = jnp.zeros_like(acc_ref)

    x = x_ref[...]                                                     # (TS, H) bf16
    # One fused MXU matmul for gate and up: RHS is (H, 2*TI).
    gu = jnp.dot(x, gu_ref[0], preferred_element_type=jnp.float32)     # (TS, 2*TI) f32
    g = gu[:, :block_i]
    u = gu[:, block_i:]
    h = (g * jax.nn.sigmoid(g)) * u                                    # f32 SiLU(gate)*up

    w = rw_ref[0]                                                      # (TS, 1) f32
    hw = (h * w).astype(mxu_dtype)                                     # fold routing weight
    acc_ref[...] += jnp.dot(hw, down_ref[0],
                            preferred_element_type=jnp.float32)        # (TS, H) f32 acc

    @pl.when((e == pl.num_programs(1) - 1) & (it == pl.num_programs(2) - 1))
    def _():
        out_ref[...] = acc_ref[...].astype(out_ref.dtype)


def dense_moe_pallas(x, rw_es1, gu_w, down_w, *, block_i, block_s=None):
    """x: (S, H); rw_es1: dense routing weights (E, S, 1) f32; gu_w: (E, H, 2*I)."""
    S, H = x.shape
    E, I, _ = down_w.shape
    TI = block_i
    assert I % TI == 0 and gu_w.shape == (E, H, 2 * I)

    w_bytes = jnp.dtype(gu_w.dtype).itemsize
    io_bytes = jnp.dtype(x.dtype).itemsize
    usable = _usable_vmem_bytes()
    TS = _select_block_s(S, H, TI, w_bytes, io_bytes, usable, user_block_s=block_s)
    budget = _vmem_budget(TS, TI, H, w_bytes, io_bytes)
    vmem_limit = int(min(usable, max(int(1.25 * budget), 32 << 20)))

    grid_spec = pltpu.PrefetchScalarGridSpec(
        num_scalar_prefetch=0,
        grid=(S // TS, E, I // TI),
        in_specs=[
            pl.BlockSpec((TS, H), lambda s, e, i: (s, 0)),            # x (resident per s tile)
            pl.BlockSpec((1, H, 2 * TI), lambda s, e, i: (e, 0, i)),  # fused gate|up tile
            pl.BlockSpec((1, TI, H), lambda s, e, i: (e, i, 0)),      # down_w tile
            pl.BlockSpec((1, TS, 1), lambda s, e, i: (e, s, 0)),      # routing column
        ],
        out_specs=pl.BlockSpec((TS, H), lambda s, e, i: (s, 0)),      # accumulator tile
        scratch_shapes=[pltpu.VMEM((TS, H), jnp.float32)],
    )

    cost = pl.CostEstimate(
        flops=6 * S * H * I * E,
        transcendentals=S * I * E,
        bytes_accessed=int(E * 3 * H * I * w_bytes + 2 * S * H * io_bytes + E * S * 4),
    )

    kernel = functools.partial(_dense_moe_kernel, block_i=TI, mxu_dtype=down_w.dtype)
    return pl.pallas_call(
        kernel,
        out_shape=jax.ShapeDtypeStruct((S, H), x.dtype),
        grid_spec=grid_spec,
        compiler_params=pltpu.CompilerParams(
            dimension_semantics=("parallel", "arbitrary", "arbitrary"),
            vmem_limit_bytes=vmem_limit),
        cost_estimate=cost,
    )(x, gu_w, down_w, rw_es1)


# --------------------------- routing (plain JAX) --------------------------- #

def fused_topk_dense_weights(gating_output, topk, renormalize, n_experts):
    """fused_topk + scatter_ into a dense (E, S, 1) f32 weight tensor."""
    scores = jax.nn.softmax(gating_output.astype(jnp.float32), axis=-1)  # (S, E)
    topk_weights, topk_ids = lax.top_k(scores, topk)                     # (S, K)
    if renormalize:
        topk_weights = topk_weights / jnp.sum(topk_weights, axis=-1, keepdims=True)
    one_hot = jax.nn.one_hot(topk_ids, n_experts, dtype=jnp.float32)     # (S, K, E)
    dense = jnp.sum(one_hot * topk_weights[..., None], axis=1)           # (S, E) f32
    # (E, S, 1): block-indexable per-expert column for the kernel.
    return jnp.transpose(dense)[..., None]


# ------------------------------ module wrapper ----------------------------- #

class DenseMoELayerPallas:
    """Mirror of DenseMoELayer.forward (hidden_act='silu', fused_topk path)."""

    def __init__(self, *, n_experts, topk, renormalize, hidden_dim, inter_dim,
                 key, weight_dtype=jnp.bfloat16, block_s=None, block_i=None):
        # TODO(synk): grouped_topk (n_expert_group/topk_group) routing and
        # gelu-family hidden_act variants are not implemented; only the
        # fused_topk + silu path of the reference module is reproduced.
        self.n_experts = n_experts
        self.topk = topk
        self.renormalize = renormalize
        self.block_s = block_s

        k1, k2, k3 = jax.random.split(key, 3)
        scale = 0.05
        gate_w = (scale * jax.random.normal(
            k1, (n_experts, hidden_dim, inter_dim), jnp.float32)).astype(weight_dtype)
        up_w = (scale * jax.random.normal(
            k2, (n_experts, hidden_dim, inter_dim), jnp.float32)).astype(weight_dtype)
        self.down_w = (scale * jax.random.normal(
            k3, (n_experts, inter_dim, hidden_dim), jnp.float32)).astype(weight_dtype)

        w_bytes = jnp.dtype(weight_dtype).itemsize
        usable = _usable_vmem_bytes()
        if block_i is None:
            block_i = _select_block_i(inter_dim, hidden_dim, w_bytes, usable)
        if inter_dim % block_i:
            raise ValueError(f"block_i={block_i} must divide inter_dim={inter_dim}")
        self.block_i = block_i

        # Fuse gate and up into one (E, H, 2*I) weight whose columns are
        # interleaved per block_i tile: [gate tile 0 | up tile 0 | gate tile 1 | ...]
        nt = inter_dim // block_i
        g4 = gate_w.reshape(n_experts, hidden_dim, nt, block_i)
        u4 = up_w.reshape(n_experts, hidden_dim, nt, block_i)
        self.gu_w = jnp.concatenate([g4, u4], axis=-1).reshape(
            n_experts, hidden_dim, 2 * inter_dim)

        # Unfused copies kept only for the pure-JAX reference check.
        self._gate_w = gate_w
        self._up_w = up_w

    @functools.partial(jax.jit, static_argnums=0)
    def __call__(self, x, gating_output):
        input_shape = x.shape
        x2d = x.reshape(-1, input_shape[-1])
        rw = fused_topk_dense_weights(
            gating_output, self.topk, self.renormalize, self.n_experts)  # (E, S, 1) f32
        out = dense_moe_pallas(x2d, rw, self.gu_w, self.down_w,
                               block_i=self.block_i, block_s=self.block_s)
        return out.reshape(input_shape)

    # pure-JAX reference (same bf16-MXU / f32-accumulate numerics as the kernel)
    def reference(self, x, gating_output):
        input_shape = x.shape
        x2d = x.reshape(-1, input_shape[-1])
        rw = fused_topk_dense_weights(
            gating_output, self.topk, self.renormalize, self.n_experts)  # (E, S, 1)
        out = jnp.zeros(x2d.shape, jnp.float32)
        for i in range(self.n_experts):
            g = jnp.dot(x2d, self._gate_w[i], preferred_element_type=jnp.float32)
            u = jnp.dot(x2d, self._up_w[i], preferred_element_type=jnp.float32)
            h = (g * jax.nn.sigmoid(g)) * u
            hw = (h * rw[i]).astype(self.down_w.dtype)
            out = out + jnp.dot(hw, self.down_w[i],
                                preferred_element_type=jnp.float32)
        return out.astype(x.dtype).reshape(input_shape)


if __name__ == "__main__":
    # Small but tiling-exercising shapes:
    # grid = (2 S-tiles, 4 experts, 2 I-tiles), fused gate|up layout with 2 tiles.
    SEQ, HIDDEN, INTER, N_EXPERTS, TOPK = 256, 256, 512, 4, 2

    key = jax.random.PRNGKey(0)
    k_x, k_gate, k_w = jax.random.split(key, 3)

    x = jax.random.normal(k_x, (SEQ, HIDDEN), jnp.float32).astype(jnp.bfloat16)
    gating_output = jax.random.normal(k_gate, (SEQ, N_EXPERTS), jnp.float32)

    layer = DenseMoELayerPallas(
        n_experts=N_EXPERTS, topk=TOPK, renormalize=True,
        hidden_dim=HIDDEN, inter_dim=INTER, key=k_w,
        weight_dtype=jnp.bfloat16, block_s=128, block_i=256)

    out = jax.block_until_ready(layer(x, gating_output))
    ref = layer.reference(x, gating_output)

    assert out.shape == (SEQ, HIDDEN)
    assert out.dtype == x.dtype
    err = float(jnp.max(jnp.abs(out.astype(jnp.float32) - ref.astype(jnp.float32))))
    assert err < 2e-2, f"mismatch vs reference: max abs err {err}"

    print("KERNEL_OK")
</pallas_src>

<mosaic_0001>
module attributes {stable_mosaic.version = 11 : i64} {
  func.func @_dense_moe_kernel(%arg0: i32, %arg1: i32, %arg2: i32, %arg3: memref<128x256xbf16, #tpu.memory_space<vmem>>, %arg4: memref<1x256x512xbf16, #tpu.memory_space<vmem>>, %arg5: memref<1x256x256xbf16, #tpu.memory_space<vmem>>, %arg6: memref<1x128x1xf32, #tpu.memory_space<vmem>>, %arg7: memref<128x256xbf16, #tpu.memory_space<vmem>>, %arg8: memref<128x256xf32, #tpu.memory_space<vmem>>) attributes {dimension_semantics = [#tpu.dimension_semantics<parallel>, #tpu.dimension_semantics<arbitrary>, #tpu.dimension_semantics<arbitrary>], iteration_bounds = array<i64: 2, 4, 2>, scalar_prefetch = 0 : i64, scratch_operands = 1 : i64, tpu.core_type = #tpu.core_type<tc>, window_params = [{transform_indices = @transform_0, window_bounds = array<i64: 128, 256>}, {transform_indices = @transform_1, window_bounds = array<i64: 1, 256, 512>}, {transform_indices = @transform_2, window_bounds = array<i64: 1, 256, 256>}, {transform_indices = @transform_3, window_bounds = array<i64: 1, 128, 1>}, {transform_indices = @transform_4, window_bounds = array<i64: 128, 256>}]} {
    %c0_i32 = arith.constant 0 : i32
    %0 = arith.cmpi eq, %arg1, %c0_i32 : i32
    %c0_i32_0 = arith.constant 0 : i32
    %1 = arith.cmpi eq, %arg2, %c0_i32_0 : i32
    %2 = arith.andi %0, %1 : i1
    %3 = arith.extui %2 : i1 to i32
    %c0_i32_1 = arith.constant 0 : i32
    %4 = arith.cmpi ne, %3, %c0_i32_1 : i32
    scf.if %4 {
      %cst_19 = arith.constant 0.000000e+00 : f32
      %34 = vector.broadcast %cst_19 : f32 to vector<128x256xf32>
      %c0_20 = arith.constant 0 : index
      %c0_21 = arith.constant 0 : index
      %35 = vector.load %arg8[%c0_20, %c0_21] : memref<128x256xf32, #tpu.memory_space<vmem>>, vector<128x256xf32>
      tpu.vector_store %arg8[%c0_20, %c0_21], %34 {strides = array<i32>} : memref<128x256xf32, #tpu.memory_space<vmem>>, vector<128x256xf32>,
    } else {
    }
    %c0 = arith.constant 0 : index
    %c0_2 = arith.constant 0 : index
    %5 = vector.load %arg3[%c0, %c0_2] : memref<128x256xbf16, #tpu.memory_space<vmem>>, vector<128x256xbf16>
    %c0_3 = arith.constant 0 : index
    %c0_4 = arith.constant 0 : index
    %c0_5 = arith.constant 0 : index
    %6 = vector.load %arg4[%c0_3, %c0_4, %c0_5] : memref<1x256x512xbf16, #tpu.memory_space<vmem>>, vector<1x256x512xbf16>
    %7 = vector.shape_cast %6 : vector<1x256x512xbf16> to vector<256x512xbf16>
    %cst = arith.constant dense<0.000000e+00> : vector<128x512xf32>
    %8 = tpu.matmul %5, %7, %cst {dimension_numbers = #tpu.dot_dimension_numbers<[1], [0], [0], [1], [0, 0, 1, 1], [], []>} : vector<128x256xbf16>, vector<256x512xbf16>, vector<128x512xf32> -> vector<128x512xf32>
    %9 = vector.extract_strided_slice %8 {offsets = [0, 0], sizes = [128, 256], strides = [1, 1]} : vector<128x512xf32> to vector<128x256xf32>
    %10 = vector.extract_strided_slice %8 {offsets = [0, 256], sizes = [128, 256], strides = [1, 1]} : vector<128x512xf32> to vector<128x256xf32>
    %11 = arith.negf %9 : vector<128x256xf32>
    %12 = math.exp %11 : vector<128x256xf32>
    %cst_6 = arith.constant 1.000000e+00 : f32
    %13 = vector.broadcast %cst_6 : f32 to vector<128x256xf32>
    %14 = arith.addf %13, %12 : vector<128x256xf32>
    %15 = arith.divf %13, %14 : vector<128x256xf32>
    %16 = arith.mulf %9, %15 : vector<128x256xf32>
    %17 = arith.mulf %16, %10 : vector<128x256xf32>
    %c0_7 = arith.constant 0 : index
    %c0_8 = arith.constant 0 : index
    %c0_9 = arith.constant 0 : index
    %18 = vector.load %arg6[%c0_7, %c0_8, %c0_9] : memref<1x128x1xf32, #tpu.memory_space<vmem>>, vector<1x128x1xf32>
    %19 = vector.shape_cast %18 : vector<1x128x1xf32> to vector<128x1xf32>
    %20 = vector.broadcast %19 : vector<128x1xf32> to vector<128x256xf32>
    %21 = arith.mulf %17, %20 : vector<128x256xf32>
    %22 = arith.truncf %21 : vector<128x256xf32> to vector<128x256xbf16>
    %c0_10 = arith.constant 0 : index
    %c0_11 = arith.constant 0 : index
    %23 = vector.load %arg8[%c0_10, %c0_11] : memref<128x256xf32, #tpu.memory_space<vmem>>, vector<128x256xf32>
    %c0_12 = arith.constant 0 : index
    %c0_13 = arith.constant 0 : index
    %c0_14 = arith.constant 0 : index
    %24 = vector.load %arg5[%c0_12, %c0_13, %c0_14] : memref<1x256x256xbf16, #tpu.memory_space<vmem>>, vector<1x256x256xbf16>
    %25 = vector.shape_cast %24 : vector<1x256x256xbf16> to vector<256x256xbf16>
    %cst_15 = arith.constant dense<0.000000e+00> : vector<128x256xf32>
    %26 = tpu.matmul %22, %25, %cst_15 {dimension_numbers = #tpu.dot_dimension_numbers<[1], [0], [0], [1], [0, 0, 1, 1], [], []>} : vector<128x256xbf16>, vector<256x256xbf16>, vector<128x256xf32> -> vector<128x256xf32>
    %27 = arith.addf %23, %26 : vector<128x256xf32>
    %c0_16 = arith.constant 0 : index
    %c0_17 = arith.constant 0 : index
    %28 = vector.load %arg8[%c0_16, %c0_17] : memref<128x256xf32, #tpu.memory_space<vmem>>, vector<128x256xf32>
    tpu.vector_store %arg8[%c0_16, %c0_17], %27 {strides = array<i32>} : memref<128x256xf32, #tpu.memory_space<vmem>>, vector<128x256xf32>,
    %c3_i32 = arith.constant 3 : i32
    %29 = arith.cmpi eq, %arg1, %c3_i32 : i32
    %c1_i32 = arith.constant 1 : i32
    %30 = arith.cmpi eq, %arg2, %c1_i32 : i32
    %31 = arith.andi %29, %30 : i1
    %32 = arith.extui %31 : i1 to i32
    %c0_i32_18 = arith.constant 0 : i32
    %33 = arith.cmpi ne, %32, %c0_i32_18 : i32
    scf.if %33 {
      %c0_19 = arith.constant 0 : index
      %c0_20 = arith.constant 0 : index
      %34 = vector.load %arg8[%c0_19, %c0_20] : memref<128x256xf32, #tpu.memory_space<vmem>>, vector<128x256xf32>
      %35 = arith.truncf %34 : vector<128x256xf32> to vector<128x256xbf16>
      %c0_21 = arith.constant 0 : index
      %c0_22 = arith.constant 0 : index
      %36 = vector.load %arg7[%c0_21, %c0_22] : memref<128x256xbf16, #tpu.memory_space<vmem>>, vector<128x256xbf16>
      tpu.vector_store %arg7[%c0_21, %c0_22], %35 {strides = array<i32>} : memref<128x256xbf16, #tpu.memory_space<vmem>>, vector<128x256xbf16>,
    } else {
    }
    return
  }
  func.func @transform_0(%arg0: i32, %arg1: i32, %arg2: i32) -> (i32, i32) {
    %c0_i32 = arith.constant 0 : i32
    %c0_i32_0 = arith.constant 0 : i32
    return %arg0, %c0_i32 : i32, i32
  }
  func.func @transform_1(%arg0: i32, %arg1: i32, %arg2: i32) -> (i32, i32, i32) {
    %c0_i32 = arith.constant 0 : i32
    %c0_i32_0 = arith.constant 0 : i32
    return %arg1, %c0_i32, %arg2 : i32, i32, i32
  }
  func.func @transform_2(%arg0: i32, %arg1: i32, %arg2: i32) -> (i32, i32, i32) {
    %c0_i32 = arith.constant 0 : i32
    %c0_i32_0 = arith.constant 0 : i32
    return %arg1, %arg2, %c0_i32 : i32, i32, i32
  }
  func.func @transform_3(%arg0: i32, %arg1: i32, %arg2: i32) -> (i32, i32, i32) {
    %c0_i32 = arith.constant 0 : i32
    %c0_i32_0 = arith.constant 0 : i32
    return %arg1, %arg0, %c0_i32 : i32, i32, i32
  }
  func.func @transform_4(%arg0: i32, %arg1: i32, %arg2: i32) -> (i32, i32) {
    %c0_i32 = arith.constant 0 : i32
    %c0_i32_0 = arith.constant 0 : i32
    return %arg0, %c0_i32 : i32, i32
  }
}

</mosaic_0001>

<bundles_post_ra>
// kernel: a_call__.1
= control target key start
LH: loop header
LB: loop body
LE: loop exit
PB: predicated region body
PF: predicated region fallthrough
CT: control target
= control target key end

     0   :  { %s3906_s0 = inlined_call_operand.hbm [shape: bf16[256,256], index: 0, kind: input, shape index: {}]   ;;  %s3907_s1 = inlined_call_operand.hbm [shape: bf16[4,256,1024], index: 1, kind: input, shape index: {}]   ;;  %s3908_s2 = inlined_call_operand.hbm [shape: bf16[4,512,256], index: 2, kind: input, shape index: {}]   ;;  %s3909_s3 = inlined_call_operand.vmem [shape: f32[4,256,1], index: 3, kind: input, shape index: {}]   ;;  %s3910_s4 = inlined_call_operand.hbm [shape: bf16[256,256], index: 4, kind: output, shape index: {}]  }
   0x1   :  { %3929 = sst [smem:[#allocation26_spill]] %s3906_s0 }
   0x2   :  { %3930 = sst [smem:[#allocation27_spill]] %s3907_s1 }
   0x3   :  { %3931 = sst [smem:[#allocation28_spill]] %s3909_s3 }
   0x4   :  { %3932 = sst [smem:[#allocation29_spill]] %s3910_s4 }
   0x5   :  { %9 = vsyncpa [#allocation4], 0 }
   0x6   :  { %11 = vsyncpa [#allocation4 + $0x1], 0 }
   0x7   :  { %12 = vsyncpa [#allocation7], 0 }
   0x8   :  { %14 = vsyncpa [#allocation7 + $0x1], 0 }
   0x9   :  { %15 = vsyncpa [#allocation5], 0 }
   0xa   :  { %17 = vsyncpa [#allocation5 + $0x1], 0  ;;  %s3172_s15 = smov 0   ;;  %s3174_s16 = smov 0  }
   0xb   :  { %s3176_s17 = smov 0   ;;  %s3178_s18 = smov 0  }
   0xc   :  { %s3180_s19 = smov 0   ;;  %s3182_s20 = smov 0  }
   0xd   :  { %s3184_s21 = smov 0   ;;  %s3186_s22 = smov 0  }
   0xe   :  { %s3188_s23 = smov 0   ;;  %s3190_s24 = smov 0  }
   0xf   :  { %s3192_s25 = smov 0   ;;  %s3194_s26 = smov 0  }
  0x10   :  { %s3196_s27 = smov 0  }
  0x11 LB: > { %3933 = sst [smem:[#allocation13_spill]] %s3096_s18  ;;  %s35_s28 = sadd.s32 1, %s3120_s24  ;;  %s3132_s27 = sphi %s3196_s27, %s23_s27   ;;  %s3128_s26 = sphi %s3194_s26, %s3985_s26   ;;  %s3124_s25 = sphi %s3192_s25, %s3995_s25   ;;  %s3120_s24 = sphi %s3190_s24, %s3994_s24   ;;  %s3116_s23 = sphi %s3188_s23, %s3982_s23   ;;  %s3112_s22 = sphi %s3186_s22, %s3993_s22   ;;  %s3108_s21 = sphi %s3184_s21, %s3992_s21   ;;  %s3104_s20 = sphi %s3182_s20, %s3981_s20   ;;  %s3100_s19 = sphi %s3180_s19, %s3991_s19   ;;  %s3096_s18 = sphi %s3178_s18, %s3990_s18   ;;  %s3092_s17 = sphi %s3176_s17, %s3989_s17   ;;  %s3088_s16 = sphi %s3174_s16, %s3988_s16   ;;  %s3084_s15 = sphi %s3172_s15, %s3987_s15  }
  0x12   : > { %3934 = sst [smem:[#allocation14_spill]] %s3104_s20  ;;  %p57_p0 = scmp.eq.s32.totalorder %s3132_s27, 0 }
  0x13   : > { %3935 = sst [smem:[#allocation15_spill]] %s3108_s21  ;;  %p3239_p1 = scmp.ge.s32.totalorder %s35_s28, 2 }
  0x14   : > { %3936 = sst [smem:[#allocation16_spill]] %s3112_s22  ;;  %p84_p2 = scmp.ne.s32.totalorder %s3092_s17, %s3088_s16 }
  0x15   : > { %3937 = sst [smem:[#allocation17_spill]] %s3128_s26  ;;  %p90_p3 = scmp.ne.s32.totalorder %s3088_s16, %s3084_s15 }
  0x16   : > { %3938 = sst [smem:[#allocation18_spill]] %s3132_s27  ;;  %s3997_s28 = smov (%p3239_p1, %s35_s28), 0 }
  0x17   : > { %3940 = sst [smem:[#allocation19_spill]] %s3997_s28  ;;  %p3254_p4 = por %p84_p2, %p57_p0 }
  0x18   : > { %p3915_p5 = scmp.lt.s32.totalorder %s3132_s27, 16  ;;  %s218_s7 = sand.u32 1, %s3132_s27  }
  0x19   : > { %s3912_s8 = sand.u32 1, %s3092_s17   ;;  %s2238_s10 = sshll.u32 %s3120_s24, 2 }
  0x1a   : > { %s2237_s9 = sshll.u32 %s3912_s8, 9  ;;  %s2239_s11 = sshll.u32 %s3124_s25, 8 }
  0x1b   : > { %s222_s12 = scalar_lea.vmem [#allocation6], %s2237_s9  ;;  %s228_s14 = sadd.s32 %s2239_s11, %s2238_s10 }
  0x1c   : > { %s231_s13 = sshll.u32 %s222_s12, 4  ;;  %s2240_s30 = sshll.u32 %s228_s14, 6  ;;  %s232_s13 = int_to_ptr.vmem [resolvable:$true] %s231_s13 }
  0x1d   : > { %p3271_p6 = pnand %p3915_p5, %p3254_p4  ;;  %s3943_s1 = sld [smem:[#allocation27_spill]] }
  0x1e   : > { %p2246_p7 = scmp.ge.s32.totalorder %s3132_s27, 1  ;;  %s3279_s8 = scalar_lea.sflag [#allocation7], %s218_s7 }
  0x1f   : > { %p3914_p8 = pneg %p3271_p6  ;;  %s2921_s9 = scalar_lea.vmem %s232_s13, 8192 }
  0x20   : > { %p2922_p9 = scmp.ne.s32.totalorder %s232_s13, %s2921_s9  ;;  %s3134_s5 = smov [#allocation6]  }
  0x21   : > { %s2926_s10 = sshll.u32 %s3134_s5, 4  ;;  %s2927_s10 = int_to_ptr.vmem [resolvable:$false] %s2926_s10 }
  0x22   : > { %p2924_p10 = pnand %p2922_p9, %p3914_p8  ;;  %s2928_s11 = scalar_lea.vmem %s2927_s10, 16384 }
  0x23   : > { %s230_s21 = scalar_lea.hbm %s3943_s1, %s2240_s30  ;;  %p2929_p12 = scmp.lt.s32.totalorder %s232_s13, %s2927_s10 }
  0x24   : > { %p2925_p11 = pneg %p2924_p10  ;;  %p2930_p13 = scmp.lt.s32.totalorder %s2928_s11, %s2921_s9 }
  0x26   : > { %p2931_p2 = por %p2930_p13, %p2929_p12 }
  0x28   : > { %p2932_p4 = pnand %p2931_p2, %p2925_p11 }
  0x2a   : > { %2935 = shalt.err (!%p2932_p4)
}
  0x2b   : > { %s3135_s3 = smov 512   ;;  %s3136_s30 = smov 256  }
  0x2c   : > { %s3137_s6 = smov 16   ;;  %p276_p9 = scmp.lt.s32.totalorder %s3132_s27, 17 }
  0x2d   : > { %2487 = dma.hbm_to_vmem [thread:$0]  (!%p3271_p6), %s230_s21, 8192, %s232_s13, %s3279_s8, %s3135_s3, %s3136_s30, %s3137_s6  }
  0x2e   : > { %p3292_p10 = pnand %p2246_p7, %p276_p9  ;;  %s3297_s12 = sadd.s32 4294967295, %s3132_s27  }
  0x2f   : > { %s2230_s14 = sadd.s32 4294967294, %s3132_s27   ;;  %s38_s9 = sadd.s32 1, %s3124_s25 }
  0x30   : > { %s42_s5 = sadd.s32 1, %s3128_s26  ;;  %s3999_s9 = smov (!%p3239_p1, %s38_s9), %s3124_s25 }
  0x31   : > { %s49_s21 = sadd.s32 1, %s3104_s20  ;;  %p56_p7 = scmp.ne.s32.totalorder %s3104_s20, %s3100_s19 }
  0x32   : > { %p40_p11 = scmp.ge.s32.totalorder %s3999_s9, 4  ;;  %p3916_p12 = scmp.ne.s32.totalorder %s3100_s19, %s3096_s18 }
  0x33   : > { %p3315_p13 = por %p57_p0, %p56_p7  ;;  %p63_p2 = scmp.eq.s32.totalorder %s3297_s12, 0 }
  0x34   : > { %s4001_s9 = smov (%p40_p11, %s3999_s9), 0  ;;  %s4003_s5 = smov (!%p40_p11, %s42_s5), %s3128_s26 }
  0x35   : > { %3946 = sst [smem:[#allocation20_spill]] %s4001_s9  ;;  %p3326_p1 = por %p63_p2, %p3916_p12 }
  0x36   : > { %s72_s10 = ssub.s32 %s3124_s25, %s4001_s9  ;;  %p44_p0 = scmp.ge.s32.totalorder %s4003_s5, 2 }
  0x37   : > { %s3948_s11 = ssub.s32 %s3120_s24, %s3997_s28  ;;  %p3338_p9 = por %p90_p3, %p63_p2 }
  0x38   : > { %s74_s3 = sor.u32 %s3948_s11, %s72_s10  ;;  %s4005_s5 = smov (%p44_p0, %s4003_s5), 0 }
  0x39   : > { %p75_p4 = scmp.eq.s32.totalorder %s74_s3, 0  ;;  %3950 = sst [smem:[#allocation21_spill]] %s4005_s5 }
  0x3a   : > { %s3951_s6 = sadd.s32 1, %s3092_s17  ;;  %s46_s22 = ssub.s32 %s3128_s26, %s4005_s5 }
  0x3b   : > { %s3347_s1 = scalar_select %p75_p4, %s3092_s17, %s3951_s6  }
  0x3c   : > { %p170_p11 = scmp.eq.s32.totalorder %s3297_s12, 15  ;;  %p47_p8 = scmp.eq.s32.totalorder %s46_s22, 0 }
  0x3d   : > { %3952 = sst [smem:[#allocation22_spill]] %s3347_s1  ;;  %p176_p5 = scmp.eq.s32.totalorder %s2230_s14, 15 }
  0x3e   : > { %p3355_p12 = por %p170_p11, %p56_p7  ;;  %s196_s15 = sand.u32 1, %s3104_s20  }
  0x3f   : > { %s3361_s11 = scalar_select %p47_p8, %s3104_s20, %s49_s21  }
  0x40   : > { %s3953_s10 = scalar_select %p3355_p12, 1, 0 }
  0x41   : > { %3955 = sst [smem:[#allocation24_spill]] %s3361_s11  ;;  %p3956_p3 = scmp.ne.s32.totalorder %s3100_s19, %s3096_s18 }
  0x42   : > { %3954 = sst [smem:[#allocation23_spill]] %s3953_s10  ;;  %s2233_s9 = sshll.u32 %s196_s15, 7 }
  0x43   : > { %p3366_p2 = por %p176_p5, %p3956_p3  ;;  %s2421_s6 = sshll.u32 %s3128_s26, 11 }
  0x44   : > { %s3959_s0 = sld [smem:[#allocation26_spill]]  ;;  %s200_s14 = scalar_lea.vmem [#allocation3], %s2233_s9 }
  0x45   : > { %s3957_s3 = scalar_select %p3366_p2, 1, 0 }
  0x46   : > { %s208_s1 = sshll.u32 %s200_s14, 4  ;;  %p3960_p7 = scmp.lt.s32.totalorder %s3132_s27, 16  ;;  %s209_s1 = int_to_ptr.vmem [resolvable:$true] %s208_s1 }
  0x47   : > { %3958 = sst [smem:[#allocation25_spill]] %s3957_s3  ;;  %s197_s21 = scalar_lea.sflag [#allocation4], %s196_s15 }
  0x48   : > { %p3378_p0 = pnand %p3960_p7, %p3315_p13  ;;  %s2949_s11 = scalar_lea.vmem %s209_s1, 2048 }
  0x49   : > { %p2950_p8 = scmp.ne.s32.totalorder %s209_s1, %s2949_s11  ;;  %s3138_s26 = smov [#allocation3]  }
  0x4a   : > { %s207_s22 = scalar_lea.hbm %s3959_s0, %s2421_s6  ;;  %p2938_p5 = pneg %p3378_p0 }
  0x4b   : > { %s2954_s28 = sshll.u32 %s3138_s26, 4  ;;  %s2955_s28 = int_to_ptr.vmem [resolvable:$false] %s2954_s28 }
  0x4c   : > { %p2952_p4 = pnand %p2950_p8, %p2938_p5  ;;  %s2956_s9 = scalar_lea.vmem %s2955_s28, 4096 }
  0x4d   : > { %p2957_p3 = scmp.lt.s32.totalorder %s209_s1, %s2955_s28  ;;  %p2958_p2 = scmp.lt.s32.totalorder %s2956_s9, %s2949_s11 }
  0x4e   : > { %p2953_p11 = pneg %p2952_p4 }
  0x4f   : > { %p2959_p12 = por %p2958_p2, %p2957_p3 }
  0x51   : > { %p2960_p13 = pnand %p2959_p12, %p2953_p11 }
  0x53   : > { %2963 = shalt.err (!%p2960_p13)
}
  0x54   : > { %s3139_s5 = smov 128   ;;  %s3140_s13 = smov 8  }
  0x55   : > { %2484 = dma.hbm_to_vmem [thread:$0]  (!%p3378_p0), %s207_s22, 2048, %s209_s1, %s197_s21, %s3139_s5, %s3139_s5, %s3140_s13  }
  0x56   : > { %s3962_s15 = sand.u32 1, %s3092_s17   ;;  %s2422_s14 = sshll.u32 %s3120_s24, 6 }
  0x57   : > { %s2241_s6 = sshll.u32 %s3962_s15, 8  ;;  %s2244_s26 = sshll.u32 %s3124_s25, 7 }
  0x58   : > { %s252_s0 = sadd.s32 %s2422_s14, %s2244_s26  ;;  %s245_s20 = scalar_lea.vmem [#allocation8], %s2241_s6 }
  0x59   : > { %s255_s28 = sshll.u32 %s245_s20, 4  ;;  %s2245_s11 = sshll.u32 %s252_s0, 6  ;;  %s256_s28 = int_to_ptr.vmem [resolvable:$true] %s255_s28 }
  0x5a   : > { %s254_s18 = scalar_lea.hbm %s3908_s2, %s2245_s11  ;;  %s2977_s27 = scalar_lea.vmem %s256_s28, 4096 }
  0x5b   : > { %p2978_p12 = scmp.ne.s32.totalorder %s256_s28, %s2977_s27  ;;  %p3963_p2 = pneg %p3271_p6 }
  0x5c   : > { %s3141_s1 = smov [#allocation8]  }
  0x5d   : > { %p2980_p7 = pnand %p2978_p12, %p3963_p2  ;;  %s2982_s10 = sshll.u32 %s3141_s1, 4  ;;  %s2983_s10 = int_to_ptr.vmem [resolvable:$false] %s2982_s10 }
  0x5e   : > { %s2984_s22 = scalar_lea.vmem %s2983_s10, 8192  ;;  %p2985_p0 = scmp.lt.s32.totalorder %s256_s28, %s2983_s10 }
  0x5f   : > { %p2981_p5 = pneg %p2980_p7  ;;  %p2986_p8 = scmp.lt.s32.totalorder %s2984_s22, %s2977_s27 }
  0x61   : > { %p2987_p4 = por %p2986_p8, %p2985_p0 }
  0x63   : > { %p2988_p11 = pnand %p2987_p4, %p2981_p5 }
  0x65   : > { %2991 = shalt.err (!%p2988_p11)
}
  0x66   : > { %2490 = dma.hbm_to_vmem [thread:$0]  (!%p3271_p6), %s254_s18, 4096, %s256_s28, %s3279_s8, %s3139_s5, %s3139_s5, %s3140_s13  }
  0x67   : > { %280 = sbr.rel (%p3292_p10) target bundleno = 755 (0x2f3), region = 36  ;;  %s3402_s0 = sand.u32 (!%p3292_p10), 1, %s3100_s19  }
  0x68   : > { %s2247_s20 = sshll.u32 (!%p3292_p10), %s3402_s0, 7  ;;  %s283_s3 = scalar_lea.sflag (!%p3292_p10), [#allocation4], %s3402_s0 }
  0x69   : > { %s3406_s21 = scalar_lea.vmem (!%p3292_p10), [#allocation3], %s2247_s20 }
  0x6c   : > { %3071 = dma.done.wait (%p3326_p1), %s283_s3, 2048  }
  0x6d   : > { %3073 = vsyncadd (%p3326_p1), %s283_s3, 4294965248  ;;  %s291_s4 = sand.u32 1, %s3297_s12   ;;  %s293_s18 = sand.u32 1, %s3088_s16  }
  0x6e   : > { %s2248_s27 = sshll.u32 %s293_s18, 9  ;;  %s292_s8 = scalar_lea.sflag [#allocation7], %s291_s4 }
  0x6f   : > { %s3414_s7 = scalar_lea.vmem [#allocation6], %s2248_s27 }
  0x70   : > { %3075 = dma.done.wait (%p3338_p9), %s292_s8, 12288  }
  0x71   : > { %3077 = vsyncadd (%p3338_p9), %s292_s8, 4294955008  ;;  %s3964_s5 = sld [smem:[#allocation16_spill]]  ;;  %s2249_s29 = sshll.u32 %s293_s18, 8 }
  0x72   : > { %s3965_s13 = sld [smem:[#allocation15_spill]]  ;;  %s2251_s15 = sshll.u32 %s3116_s23, 4 }
  0x73   : > { %p354_p10 = scmp.lt.s32.totalorder %s2251_s15, 31  ;;  %s3966_s28 = sld [smem:[#allocation28_spill]] }
  0x74   : > { %s3430_s9 = scalar_lea.vmem [#allocation8], %s2249_s29  ;;  %s3432_s1 = scalar_lea.vmem [#allocation9], %s2247_s20 }
  0x75   : > { %s4009_s15 = smov (!%p354_p10, %s2251_s15), 31 }
  0x77   : > { %p352_p6 = scmp.lt.s32.totalorder %s3964_s5, 3  ;;  %p362_p1 = scmp.eq.s32.totalorder %s3964_s5, 0 }
  0x78   : > { %p363_p3 = scmp.eq.s32.totalorder %s3965_s13, 0 }
  0x79   : > { %s4007_s5 = smov (!%p352_p6, %s3964_s5), 3 }
  0x7a   : > { %s2252_s12 = sshll.u32 %s4007_s5, 5  ;;  %p364_p13 = pnand %p363_p3, %p362_p1 }
  0x7b   : > { %s357_s6 = sadd.s32 %s2252_s12, %s4009_s15 }
  0x7c   : > { %s2253_s14 = sshll.u32 %s357_s6, 3  ;;  %367 = sbr.rel (%p364_p13) target bundleno = 146 (0x92), region = 52 }
  0x7d   : > { %s3428_s11 = scalar_lea.vmem %s3966_s28, %s2253_s14 }
  0x81   : > { %v3142_v0 = vmov 0.0  }
  0x82   : > { %368 = vst [vmem:[#allocation2 + $0xb0] sm:$0xff] %v3142_v0  ;;  %369 = vst [vmem:[#allocation2] sm:$0xff] %v3142_v0 }
  0x83   : > { %370 = vst [vmem:[#allocation2 + $0xd8] sm:$0xff] %v3142_v0  ;;  %371 = vst [vmem:[#allocation2 + $0x18] sm:$0xff] %v3142_v0 }
  0x84   : > { %372 = vst [vmem:[#allocation2 + $0x50] sm:$0xff] %v3142_v0  ;;  %373 = vst [vmem:[#allocation2 + $0x68] sm:$0xff] %v3142_v0 }
  0x85   : > { %374 = vst [vmem:[#allocation2 + $0x30] sm:$0xff] %v3142_v0  ;;  %375 = vst [vmem:[#allocation2 + $0x48] sm:$0xff] %v3142_v0 }
  0x86   : > { %376 = vst [vmem:[#allocation2 + $0x80] sm:$0xff] %v3142_v0  ;;  %377 = vst [vmem:[#allocation2 + $0x88] sm:$0xff] %v3142_v0 }
  0x87   : > { %378 = vst [vmem:[#allocation2 + $0xe8] sm:$0xff] %v3142_v0  ;;  %379 = vst [vmem:[#allocation2 + $0xb8] sm:$0xff] %v3142_v0 }
  0x88   : > { %380 = vst [vmem:[#allocation2 + $0x60] sm:$0xff] %v3142_v0  ;;  %381 = vst [vmem:[#allocation2 + $0xf0] sm:$0xff] %v3142_v0 }
  0x89   : > { %382 = vst [vmem:[#allocation2 + $0x8] sm:$0xff] %v3142_v0  ;;  %383 = vst [vmem:[#allocation2 + $0x78] sm:$0xff] %v3142_v0 }
  0x8a   : > { %384 = vst [vmem:[#allocation2 + $0x38] sm:$0xff] %v3142_v0  ;;  %385 = vst [vmem:[#allocation2 + $0x58] sm:$0xff] %v3142_v0 }
  0x8b   : > { %386 = vst [vmem:[#allocation2 + $0x40] sm:$0xff] %v3142_v0  ;;  %387 = vst [vmem:[#allocation2 + $0xc8] sm:$0xff] %v3142_v0 }
  0x8c   : > { %388 = vst [vmem:[#allocation2 + $0xe0] sm:$0xff] %v3142_v0  ;;  %389 = vst [vmem:[#allocation2 + $0x90] sm:$0xff] %v3142_v0 }
  0x8d   : > { %390 = vst [vmem:[#allocation2 + $0x70] sm:$0xff] %v3142_v0  ;;  %391 = vst [vmem:[#allocation2 + $0xc0] sm:$0xff] %v3142_v0 }
  0x8e   : > { %392 = vst [vmem:[#allocation2 + $0xa8] sm:$0xff] %v3142_v0  ;;  %393 = vst [vmem:[#allocation2 + $0xd0] sm:$0xff] %v3142_v0 }
  0x8f   : > { %394 = vst [vmem:[#allocation2 + $0x10] sm:$0xff] %v3142_v0  ;;  %395 = vst [vmem:[#allocation2 + $0x28] sm:$0xff] %v3142_v0 }
  0x90   : > { %396 = vst [vmem:[#allocation2 + $0xa0] sm:$0xff] %v3142_v0  ;;  %397 = vst [vmem:[#allocation2 + $0xf8] sm:$0xff] %v3142_v0 }
  0x91   : > { %398 = vst [vmem:[#allocation2 + $0x20] sm:$0xff] %v3142_v0  ;;  %399 = vst [vmem:[#allocation2 + $0x98] sm:$0xff] %v3142_v0 }
  0x92 PF: > { %v2612_v1 = vld [vmem:[%s3414_s7 + $0xe4] ss:$16 sps:$4 sm:$0xff]   ;;  %v2614_v2 = vld [vmem:[%s3414_s7 + $0xe0] ss:$16 sps:$4 sm:$0xff]   ;;  %v3143_v6 = vmov 0   ;;  %v1363_v60 = vld [vmem:[%s3428_s11 + $0x8] sm:$0xff] }
  0x93   : > { %880 = vmatprep.subr.bf16.mxu0 %v2612_v1  ;;  %v2615_v3 = vld [vmem:[%s3414_s7 + $0xc4] ss:$16 sps:$4 sm:$0xff]   ;;  %v2617_v4 = vld [vmem:[%s3414_s7 + $0xc0] ss:$16 sps:$4 sm:$0xff]   ;;  %2610 = vset.pattern.permute.xlu0 %v3143_v6  ;;  %v2635_v10 = vld [vmem:[%s3414_s7 + $0xec] ss:$16 sps:$4 sm:$0xff]  }
  0x94   : > { %881 = vmatpush1.bf16.msra.mxu0 %v2614_v2  ;;  %v2618_v5 = vld [vmem:[%s3414_s7 + $0xa4] ss:$16 sps:$4 sm:$0xff]   ;;  %2611 = vset.pattern.permute.xlu1 %v3143_v6  ;;  %v2620_v7 = vld [vmem:[%s3414_s7 + $0xa0] ss:$16 sps:$4 sm:$0xff]   ;;  %v2638_v11 = vld [vmem:[%s3414_s7 + $0xe8] ss:$16 sps:$4 sm:$0xff]  }
  0x95   : > { %882 = vmatprep.subr.bf16.mxu0 %v2615_v3  ;;  %v2621_v8 = vld [vmem:[%s3414_s7 + $0x84] ss:$16 sps:$4 sm:$0xff]   ;;  %v2623_v9 = vld [vmem:[%s3414_s7 + $0x80] ss:$16 sps:$4 sm:$0xff]   ;;  %993 = vmatprep.subr.bf16.mxu1 %v2635_v10  ;;  %v2641_v13 = vld [vmem:[%s3414_s7 + $0xcc] ss:$16 sps:$4 sm:$0xff]  }
  0x96   : > { %v2624_v12 = vld [vmem:[%s3414_s7 + $0x64] ss:$16 sps:$4 sm:$0xff]   ;;  %994 = vmatpush1.bf16.msra.mxu1 %v2638_v11  ;;  %v2644_v14 = vld [vmem:[%s3414_s7 + $0xc8] ss:$16 sps:$4 sm:$0xff]   ;;  %v2626_v15 = vld [vmem:[%s3414_s7 + $0x60] ss:$16 sps:$4 sm:$0xff]  }
  0x97   : > { %995 = vmatprep.subr.bf16.mxu1 %v2641_v13  ;;  %v2627_v16 = vld [vmem:[%s3414_s7 + $0x44] ss:$16 sps:$4 sm:$0xff]   ;;  %v2647_v17 = vld [vmem:[%s3414_s7 + $0xac] ss:$16 sps:$4 sm:$0xff]   ;;  %v2650_v18 = vld [vmem:[%s3414_s7 + $0xa8] ss:$16 sps:$4 sm:$0xff]  }
  0x98   : > { %883 = vmatpush1.bf16.msra.mxu0 %v2617_v4  ;;  %v2629_v19 = vld [vmem:[%s3414_s7 + $0x40] ss:$16 sps:$4 sm:$0xff]   ;;  %v2653_v20 = vld [vmem:[%s3414_s7 + $0x8c] ss:$16 sps:$4 sm:$0xff]   ;;  %v2630_v21 = vld [vmem:[%s3414_s7 + $0x24] ss:$16 sps:$4 sm:$0xff]  }
  0x99   : > { %884 = vmatprep.subr.bf16.mxu0 %v2618_v5  ;;  %v2632_v22 = vld [vmem:[%s3414_s7 + $0x20] ss:$16 sps:$4 sm:$0xff]   ;;  %v2656_v23 = vld [vmem:[%s3414_s7 + $0x88] ss:$16 sps:$4 sm:$0xff]   ;;  %v2659_v24 = vld [vmem:[%s3414_s7 + $0x6c] ss:$16 sps:$4 sm:$0xff]  }
  0x9a   : > { %996 = vmatpush1.bf16.msra.mxu1 %v2644_v14  ;;  %v2633_v25 = vld [vmem:[%s3414_s7 + $0x4] ss:$16 sps:$4 sm:$0xff]   ;;  %v2662_v26 = vld [vmem:[%s3414_s7 + $0x68] ss:$16 sps:$4 sm:$0xff]   ;;  %v2637_v27 = vld [vmem:[%s3414_s7] ss:$16 sps:$4 sm:$0xff]  }
  0x9b   : > { %997 = vmatprep.subr.bf16.mxu1 %v2647_v17  ;;  %v2665_v28 = vld [vmem:[%s3414_s7 + $0x4c] ss:$16 sps:$4 sm:$0xff]   ;;  %v2639_v29 = vld [vmem:[%s3414_s7 + $0x1e4] ss:$16 sps:$4 sm:$0xff]   ;;  %v2643_v30 = vld [vmem:[%s3414_s7 + $0x1e0] ss:$16 sps:$4 sm:$0xff]  }
  0x9c   : > { %885 = vmatpush1.bf16.msra.mxu0 %v2620_v7  ;;  %v2668_v31 = vld [vmem:[%s3414_s7 + $0x48] ss:$16 sps:$4 sm:$0xff]   ;;  %v2671_v32 = vld [vmem:[%s3414_s7 + $0x2c] ss:$16 sps:$4 sm:$0xff]   ;;  %v2645_v33 = vld [vmem:[%s3414_s7 + $0x1c4] ss:$16 sps:$4 sm:$0xff]  }
  0x9d   : > { %886 = vmatprep.subr.bf16.mxu0 %v2621_v8  ;;  %v2674_v34 = vld [vmem:[%s3414_s7 + $0x28] ss:$16 sps:$4 sm:$0xff]   ;;  %v2689_v35 = vld [vmem:[%s3406_s21 + $0x4] ss:$8 sps:$4 sm:$0xff]   ;;  %v2649_v36 = vld [vmem:[%s3414_s7 + $0x1c0] ss:$16 sps:$4 sm:$0xff]  }
  0x9e   : > { %998 = vmatpush1.bf16.msra.mxu1 %v2650_v18  ;;  %v2677_v37 = vld [vmem:[%s3414_s7 + $0xc] ss:$16 sps:$4 sm:$0xff]   ;;  %v2651_v38 = vld [vmem:[%s3414_s7 + $0x1a4] ss:$16 sps:$4 sm:$0xff]   ;;  %912 = vmatprep.mubr.bf16.mxu0 %v2689_v35  ;;  %v2680_v39 = vld [vmem:[%s3414_s7 + $0x8] ss:$16 sps:$4 sm:$0xff]  }
  0x9f   : > { %999 = vmatprep.subr.bf16.mxu1 %v2653_v20  ;;  %1025 = vmatprep.mubr.bf16.mxu1 %v2689_v35  ;;  %v2655_v40 = vld [vmem:[%s3414_s7 + $0x1a0] ss:$16 sps:$4 sm:$0xff]   ;;  %v2683_v41 = vld [vmem:[%s3414_s7 + $0x1ec] ss:$16 sps:$4 sm:$0xff]   ;;  %v2657_v42 = vld [vmem:[%s3414_s7 + $0x184] ss:$16 sps:$4 sm:$0xff]  }
  0xa0   : > { %887 = vmatpush1.bf16.msra.mxu0 %v2623_v9  ;;  %v2686_v43 = vld [vmem:[%s3414_s7 + $0x1e8] ss:$16 sps:$4 sm:$0xff]   ;;  %v2661_v44 = vld [vmem:[%s3414_s7 + $0x180] ss:$16 sps:$4 sm:$0xff]   ;;  %v2690_v45 = vld [vmem:[%s3414_s7 + $0x1cc] ss:$16 sps:$4 sm:$0xff]  }
  0xa1   : > { %888 = vmatprep.subr.bf16.mxu0 %v2624_v12  ;;  %v2663_v46 = vld [vmem:[%s3414_s7 + $0x164] ss:$16 sps:$4 sm:$0xff]   ;;  %v2692_v47 = vld [vmem:[%s3414_s7 + $0x1c8] ss:$16 sps:$4 sm:$0xff]   ;;  %v2667_v48 = vld [vmem:[%s3414_s7 + $0x160] ss:$16 sps:$4 sm:$0xff]  }
  0xa2   : > { %1000 = vmatpush1.bf16.msra.mxu1 %v2656_v23  ;;  %v2693_v49 = vld [vmem:[%s3414_s7 + $0x1ac] ss:$16 sps:$4 sm:$0xff]   ;;  %v2669_v50 = vld [vmem:[%s3414_s7 + $0x144] ss:$16 sps:$4 sm:$0xff]   ;;  %v2695_v51 = vld [vmem:[%s3414_s7 + $0x1a8] ss:$16 sps:$4 sm:$0xff]  }
  0xa3   : > { %1001 = vmatprep.subr.bf16.mxu1 %v2659_v24  ;;  %v2673_v52 = vld [vmem:[%s3414_s7 + $0x140] ss:$16 sps:$4 sm:$0xff]   ;;  %v2699_v53 = vld [vmem:[%s3414_s7 + $0x18c] ss:$16 sps:$4 sm:$0xff]   ;;  %v2675_v54 = vld [vmem:[%s3414_s7 + $0x124] ss:$16 sps:$4 sm:$0xff]  }
  0xa4   : > { %889 = vmatpush1.bf16.msra.mxu0 %v2626_v15  ;;  %v1362_v55 = vld [vmem:[%s3428_s11] sm:$0xff]  ;;  %v2701_v57 = vld [vmem:[%s3414_s7 + $0x188] ss:$16 sps:$4 sm:$0xff]   ;;  %v2702_v59 = vld [vmem:[%s3414_s7 + $0x16c] ss:$16 sps:$4 sm:$0xff]   ;;  %s3967_s10 = sld [smem:[#allocation16_spill]] }
  0xa5   : > { %890 = vmatprep.subr.bf16.mxu0 %v2627_v16  ;;  %v1370_v56 = vld [vmem:[%s3428_s11 + $0x40] sm:$0xff]  ;;  %1380 = vperm.xlu0 %2610, %v1362_v55   ;;  %v1371_v62 = vld [vmem:[%s3428_s11 + $0x48] sm:$0xff]  ;;  %v1364_v2 = vld [vmem:[%s3428_s11 + $0x10] sm:$0xff]  ;;  %s3968_s22 = sld [smem:[#allocation15_spill]] }
  0xa6   : > { %1002 = vmatpush1.bf16.msra.mxu1 %v2662_v26  ;;  %v2679_v58 = vld [vmem:[%s3414_s7 + $0x120] ss:$16 sps:$4 sm:$0xff]   ;;  %v2681_v61 = vld [vmem:[%s3414_s7 + $0x104] ss:$16 sps:$4 sm:$0xff]   ;;  %1420 = vperm.xlu1 %2611, %v1370_v56   ;;  %v2704_v0 = vld [vmem:[%s3414_s7 + $0x168] ss:$16 sps:$4 sm:$0xff]  }
  0xa7   : > { %1003 = vmatprep.subr.bf16.mxu1 %v2665_v28  ;;  %v2685_v63 = vld [vmem:[%s3414_s7 + $0x100] ss:$16 sps:$4 sm:$0xff]   ;;  %v2708_v1 = vld [vmem:[%s3414_s7 + $0x14c] ss:$16 sps:$4 sm:$0xff]   ;;  %v2710_v7 = vld [vmem:[%s3414_s7 + $0x148] ss:$16 sps:$4 sm:$0xff]  }
  0xa8   : > { %891 = vmatpush1.bf16.msra.mxu0 %v2629_v19  ;;  %v2687_v3 = vld [vmem:[%s3406_s21] ss:$8 sps:$4 sm:$0xff]   ;;  %v2734_v4 = vld [vmem:[%s3430_s9 + $0x74] ss:$8 sps:$4 sm:$0xff]   ;;  %v2732_v11 = vld [vmem:[%s3430_s9 + $0x70] ss:$8 sps:$4 sm:$0xff]  }
  0xa9   : > { %892 = vmatprep.subr.bf16.mxu0 %v2630_v21  ;;  %1385 = vperm.xlu0 %2610, %v1363_v60   ;;  %v2696_v5 = vld [vmem:[%s3406_s21 + $0x14] ss:$8 sps:$4 sm:$0xff]   ;;  %v2713_v12 = vld [vmem:[%s3414_s7 + $0x128] ss:$16 sps:$4 sm:$0xff]   ;;  %v2737_v13 = vld [vmem:[%s3430_s9 + $0x64] ss:$8 sps:$4 sm:$0xff]  }
  0xaa   : > { %1004 = vmatpush1.bf16.msra.mxu1 %v2668_v31  ;;  %1425 = vperm.xlu1 %2611, %v1371_v62   ;;  %v1365_v6 = vld [vmem:[%s3428_s11 + $0x18] sm:$0xff]  ;;  %v1372_v9 = vld [vmem:[%s3428_s11 + $0x50] sm:$0xff]  ;;  %v1366_v15 = vld [vmem:[%s3428_s11 + $0x20] sm:$0xff]  ;;  %p1907_p9 = scmp.eq.s32.totalorder %s3967_s10, 3 }
  0xab   : > { %1005 = vmatprep.subr.bf16.mxu1 %v2671_v32  ;;  %v2711_v8 = vld [vmem:[%s3414_s7 + $0x12c] ss:$16 sps:$4 sm:$0xff]   ;;  %v2735_v17 = vld [vmem:[%s3430_s9 + $0x60] ss:$8 sps:$4 sm:$0xff]   ;;  %v2698_v18 = vld [vmem:[%s3406_s21 + $0x10] ss:$8 sps:$4 sm:$0xff]  }
  0xac   : > { %893 = vmatpush1.bf16.msra.mxu0 %v2632_v22  ;;  %v1373_v10 = vld [vmem:[%s3428_s11 + $0x58] sm:$0xff]  ;;  %v1367_v16 = vld [vmem:[%s3428_s11 + $0x28] sm:$0xff]  ;;  %v1374_v22 = vld [vmem:[%s3428_s11 + $0x60] sm:$0xff]  ;;  %p1908_p12 = scmp.eq.s32.totalorder %s3968_s22, 1 }
  0xad   : > { %894 = vmatprep.subr.bf16.mxu0 %v2633_v25  ;;  %1390 = vperm.xlu0 %2610, %v1364_v2   ;;  %v2717_v14 = vld [vmem:[%s3414_s7 + $0x10c] ss:$16 sps:$4 sm:$0xff]   ;;  %v2719_v19 = vld [vmem:[%s3414_s7 + $0x108] ss:$16 sps:$4 sm:$0xff]   ;;  %v1368_v26 = vld [vmem:[%s3428_s11 + $0x30] sm:$0xff] }
  0xae   : > { %1006 = vmatpush1.bf16.msra.mxu1 %v2674_v34  ;;  %1395 = vperm.xlu1 %2611, %v1365_v6   ;;  %v2705_v20 = vld [vmem:[%s3406_s21 + $0x24] ss:$8 sps:$4 sm:$0xff]   ;;  %v2740_v21 = vld [vmem:[%s3430_s9 + $0x54] ss:$8 sps:$4 sm:$0xff]   ;;  %v2738_v24 = vld [vmem:[%s3430_s9 + $0x50] ss:$8 sps:$4 sm:$0xff]   ;;  %p3803_p2 = pnand %p1908_p12, %p1907_p9 }
  0xaf   : > { %1007 = vmatprep.subr.bf16.mxu1 %v2677_v37  ;;  %v1375_v23 = vld [vmem:[%s3428_s11 + $0x68] sm:$0xff]  ;;  %v1377_v31 = vld [vmem:[%s3428_s11 + $0x78] sm:$0xff]  ;;  %v1376_v32 = vld [vmem:[%s3428_s11 + $0x70] sm:$0xff] }
  0xb0   : > { %895 = vmatpush1.bf16.msra.mxu0 %v2637_v27  ;;  %v2743_v25 = vld [vmem:[%s3430_s9 + $0x44] ss:$8 sps:$4 sm:$0xff]   ;;  %v1369_v27 = vld [vmem:[%s3428_s11 + $0x38] sm:$0xff]  ;;  %v2741_v28 = vld [vmem:[%s3430_s9 + $0x40] ss:$8 sps:$4 sm:$0xff]  }
  0xb1   : > { %896 = vmatprep.subr.bf16.mxu0 %v2639_v29  ;;  %1430 = vperm.xlu0 %2610, %v1372_v9   ;;  %v2707_v29 = vld [vmem:[%s3406_s21 + $0x20] ss:$8 sps:$4 sm:$0xff]   ;;  %v2720_v34 = vld [vmem:[%s3406_s21 + $0x44] ss:$8 sps:$4 sm:$0xff]   ;;  %v2725_v37 = vld [vmem:[%s3406_s21 + $0x50] ss:$8 sps:$4 sm:$0xff]  }
  0xb2   : > { %1008 = vmatpush1.bf16.msra.mxu1 %v2680_v39  ;;  %1435 = vperm.xlu1 %2611, %v1373_v10   ;;  %v2722_v35 = vld [vmem:[%s3406_s21 + $0x40] ss:$8 sps:$4 sm:$0xff]   ;;  %v2762_v55 = vld [vmem:[%s3430_s9 + $0xd0] ss:$8 sps:$4 sm:$0xff]   ;;  %v2767_v56 = vld [vmem:[%s3430_s9 + $0xc4] ss:$8 sps:$4 sm:$0xff]  }
  0xb3   : > { %1009 = vmatprep.subr.bf16.mxu1 %v2683_v41  ;;  %v2728_v39 = vld [vmem:[%s3406_s21 + $0x60] ss:$8 sps:$4 sm:$0xff]   ;;  %v2731_v41 = vld [vmem:[%s3406_s21 + $0x70] ss:$8 sps:$4 sm:$0xff]   ;;  %v2773_v60 = vld [vmem:[%s3430_s9 + $0xa4] ss:$8 sps:$4 sm:$0xff]  }
  0xb4   : > { %897 = vmatpush2.bf16.msra.mxu0 %v2643_v30  ;;  %v2714_v30 = vld [vmem:[%s3406_s21 + $0x34] ss:$8 sps:$4 sm:$0xff]  }
  0xb5   : > { %898 = vmatprep.subr.bf16.mxu0 %v2645_v33  ;;  %1400 = vperm.xlu0 %2610, %v1366_v15   ;;  %v2716_v33 = vld [vmem:[%s3406_s21 + $0x30] ss:$8 sps:$4 sm:$0xff]   ;;  %v2776_v62 = vld [vmem:[%s3430_s9 + $0x94] ss:$8 sps:$4 sm:$0xff]  }
  0xb6   : > { %1010 = vmatpush2.bf16.msra.mxu1 %v2686_v43  ;;  %1405 = vperm.xlu1 %2611, %v1367_v16   ;;  %v2744_v43 = vld [vmem:[%s3430_s9 + $0x30] ss:$8 sps:$4 sm:$0xff]  }
  0xb7   : > { %1011 = vmatprep.subr.bf16.mxu1 %v2690_v45  ;;  %v2747_v45 = vld [vmem:[%s3430_s9 + $0x20] ss:$8 sps:$4 sm:$0xff]  }
  0xb8   : > { %899 = vmatpush2.bf16.msra.mxu0 %v2649_v36  ;;  %v2723_v36 = vld [vmem:[%s3406_s21 + $0x54] ss:$8 sps:$4 sm:$0xff]  }
  0xb9   : > { %900 = vmatprep.subr.bf16.mxu0 %v2651_v38  ;;  %1440 = vperm.xlu0 %2610, %v1374_v22   ;;  %v2726_v38 = vld [vmem:[%s3406_s21 + $0x64] ss:$8 sps:$4 sm:$0xff]  }
  0xba   : > { %1012 = vmatpush2.bf16.msra.mxu1 %v2692_v47  ;;  %1445 = vperm.xlu1 %2611, %v1375_v23   ;;  %v2750_v47 = vld [vmem:[%s3430_s9 + $0x10] ss:$8 sps:$4 sm:$0xff]  }
  0xbb   : > { %1013 = vmatprep.subr.bf16.mxu1 %v2693_v49  ;;  %v2753_v49 = vld [vmem:[%s3430_s9] ss:$8 sps:$4 sm:$0xff]  }
  0xbc   : > { %901 = vmatpush2.bf16.msra.mxu0 %v2655_v40  ;;  %v2729_v40 = vld [vmem:[%s3406_s21 + $0x74] ss:$8 sps:$4 sm:$0xff]  }
  0xbd   : > { %902 = vmatprep.subr.bf16.mxu0 %v2657_v42  ;;  %1410 = vperm.xlu0 %2610, %v1368_v26   ;;  %v2746_v42 = vld [vmem:[%s3430_s9 + $0x34] ss:$8 sps:$4 sm:$0xff]  }
  0xbe   : > { %1014 = vmatpush2.bf16.msra.mxu1 %v2695_v51  ;;  %1415 = vperm.xlu1 %2611, %v1369_v27   ;;  %v2756_v51 = vld [vmem:[%s3430_s9 + $0xf0] ss:$8 sps:$4 sm:$0xff]  }
  0xbf   : > { %1015 = vmatprep.subr.bf16.mxu1 %v2699_v53  ;;  %v2759_v53 = vld [vmem:[%s3430_s9 + $0xe0] ss:$8 sps:$4 sm:$0xff]  }
  0xc0   : > { %903 = vmatpush2.bf16.msra.mxu0 %v2661_v44  ;;  %v2749_v44 = vld [vmem:[%s3430_s9 + $0x24] ss:$8 sps:$4 sm:$0xff]  }
  0xc1   : > { %904 = vmatprep.subr.bf16.mxu0 %v2663_v46  ;;  %1450 = vperm.xlu0 %2610, %v1376_v32   ;;  %v2752_v46 = vld [vmem:[%s3430_s9 + $0x14] ss:$8 sps:$4 sm:$0xff]  }
  0xc2   : > { %1016 = vmatpush2.bf16.msra.mxu1 %v2701_v57  ;;  %1455 = vperm.xlu1 %2611, %v1377_v31   ;;  %v2765_v57 = vld [vmem:[%s3430_s9 + $0xc0] ss:$8 sps:$4 sm:$0xff]  }
  0xc3   : > { %1017 = vmatprep.subr.bf16.mxu1 %v2702_v59  ;;  %v2768_v59 = vld [vmem:[%s3430_s9 + $0xb0] ss:$8 sps:$4 sm:$0xff]  }
  0xc4   : > { %905 = vmatpush2.bf16.msra.mxu0 %v2667_v48  ;;  %v2755_v48 = vld [vmem:[%s3430_s9 + $0x4] ss:$8 sps:$4 sm:$0xff]  }
  0xc5   : > { %906 = vmatprep.subr.bf16.mxu0 %v2669_v50  ;;  %v2758_v50 = vld [vmem:[%s3430_s9 + $0xf4] ss:$8 sps:$4 sm:$0xff]  }
  0xc6   : > { %1018 = vmatpush2.bf16.msra.mxu1 %v2704_v0  ;;  %v2779_v0 = vld [vmem:[%s3430_s9 + $0x84] ss:$8 sps:$4 sm:$0xff]  }
  0xc7   : > { %1019 = vmatprep.subr.bf16.mxu1 %v2708_v1  ;;  %v2777_v1 = vld [vmem:[%s3430_s9 + $0x80] ss:$8 sps:$4 sm:$0xff]  }
  0xc8   : > { %907 = vmatpush2.bf16.msra.mxu0 %v2673_v52  ;;  %v2761_v52 = vld [vmem:[%s3430_s9 + $0xe4] ss:$8 sps:$4 sm:$0xff]  }
  0xc9   : > { %908 = vmatprep.subr.bf16.mxu0 %v2675_v54  ;;  %v2764_v54 = vld [vmem:[%s3430_s9 + $0xd4] ss:$8 sps:$4 sm:$0xff]  }
  0xca   : > { %1020 = vmatpush2.bf16.msra.mxu1 %v2710_v7 }
  0xcb   : > { %1021 = vmatprep.subr.bf16.mxu1 %v2711_v8 }
  0xcc   : > { %909 = vmatpush2.bf16.msra.mxu0 %v2679_v58  ;;  %v2770_v58 = vld [vmem:[%s3430_s9 + $0xb4] ss:$8 sps:$4 sm:$0xff]  }
  0xcd   : > { %910 = vmatprep.subr.bf16.mxu0 %v2681_v61  ;;  %v2771_v61 = vld [vmem:[%s3430_s9 + $0xa0] ss:$8 sps:$4 sm:$0xff]  }
  0xce   : > { %1022 = vmatpush2.bf16.msra.mxu1 %v2713_v12 }
  0xcf   : > { %1023 = vmatprep.subr.bf16.mxu1 %v2717_v14 }
  0xd0   : > { %911 = vmatpush2.bf16.msra.mxu0 %v2685_v63  ;;  %v2774_v63 = vld [vmem:[%s3430_s9 + $0x90] ss:$8 sps:$4 sm:$0xff]  }
  0xd1   : > { %1730 = vmatprep.subr.bf16.mxu0 %v2734_v4 }
  0xd2   : > { %1024 = vmatpush2.bf16.msra.mxu1 %v2719_v19 }
  0xd3   : > { %913 = vmatmul.mubr.bf16.vlgmr.msra.gmra.mxu0 %v2687_v3  ;;  %2441 = vmatprep.subr.bf16.mxu1 %v2734_v4 }
  0xd4   : > { %922 = vmatprep.mubr.bf16.mxu0 %v2696_v5  ;;  %1731 = vmatpush1.bf16.msra.mxu0 %v2732_v11 }
  0xd5   : > { %1732 = vmatprep.subr.bf16.mxu0 %v2737_v13  ;;  %1026 = vmatmul.mubr.bf16.vlgmr.msra.gmra.mxu1 %v2687_v3 }
  0xd6   : > { %1035 = vmatprep.mubr.bf16.mxu1 %v2696_v5  ;;  %2457 = vmatpush1.bf16.msra.mxu1 %v2732_v11 }
  0xd7   : > { %2442 = vmatprep.subr.bf16.mxu1 %v2737_v13 }
  0xd8   : > { %1733 = vmatpush1.bf16.msra.mxu0 %v2735_v17 }
  0xd9   : > { %1734 = vmatprep.subr.bf16.mxu0 %v2740_v21 }
  0xda   : > { %2458 = vmatpush1.bf16.msra.mxu1 %v2735_v17 }
  0xdb   : > { %923 = vmatmul.mubr.bf16.gmra.mxu0 %v2698_v18  ;;  %2443 = vmatprep.subr.bf16.mxu1 %v2740_v21 }
  0xdc   : > { %932 = vmatprep.mubr.bf16.mxu0 %v2705_v20  ;;  %1735 = vmatpush1.bf16.msra.mxu0 %v2738_v24 }
  0xdd   : > { %1736 = vmatprep.subr.bf16.mxu0 %v2743_v25  ;;  %1036 = vmatmul.mubr.bf16.gmra.mxu1 %v2698_v18 }
  0xde   : > { %1045 = vmatprep.mubr.bf16.mxu1 %v2705_v20  ;;  %2459 = vmatpush1.bf16.msra.mxu1 %v2738_v24 }
  0xdf   : > { %2444 = vmatprep.subr.bf16.mxu1 %v2743_v25 }
  0xe0   : > { %1737 = vmatpush1.bf16.msra.mxu0 %v2741_v28 }
  0xe1   : > { %1738 = vmatprep.subr.bf16.mxu0 %v2746_v42 }
  0xe2   : > { %2460 = vmatpush1.bf16.msra.mxu1 %v2741_v28 }
  0xe3   : > { %933 = vmatmul.mubr.bf16.gmra.mxu0 %v2707_v29  ;;  %2445 = vmatprep.subr.bf16.mxu1 %v2746_v42 }
  0xe4   : > { %942 = vmatprep.mubr.bf16.mxu0 %v2714_v30  ;;  %1739 = vmatpush1.bf16.msra.mxu0 %v2744_v43 }
  0xe5   : > { %1046 = vmatmul.mubr.bf16.gmra.mxu1 %v2707_v29  ;;  %1740 = vmatprep.subr.bf16.mxu0 %v2749_v44 }
  0xe6   : > { %1055 = vmatprep.mubr.bf16.mxu1 %v2714_v30  ;;  %2461 = vmatpush1.bf16.msra.mxu1 %v2744_v43 }
  0xe7   : > { %2446 = vmatprep.subr.bf16.mxu1 %v2749_v44 }
  0xe8   : > { %1741 = vmatpush1.bf16.msra.mxu0 %v2747_v45 }
  0xe9   : > { %1742 = vmatprep.subr.bf16.mxu0 %v2752_v46 }
  0xea   : > { %2462 = vmatpush1.bf16.msra.mxu1 %v2747_v45 }
  0xeb   : > { %943 = vmatmul.mubr.bf16.gmra.mxu0 %v2716_v33  ;;  %2447 = vmatprep.subr.bf16.mxu1 %v2752_v46 }
  0xec   : > { %952 = vmatprep.mubr.bf16.mxu0 %v2720_v34  ;;  %1743 = vmatpush1.bf16.msra.mxu0 %v2750_v47 }
  0xed   : > { %1056 = vmatmul.mubr.bf16.gmra.mxu1 %v2716_v33  ;;  %1744 = vmatprep.subr.bf16.mxu0 %v2755_v48 }
  0xee   : > { %1065 = vmatprep.mubr.bf16.mxu1 %v2720_v34  ;;  %2463 = vmatpush1.bf16.msra.mxu1 %v2750_v47 }
  0xef   : > { %2448 = vmatprep.subr.bf16.mxu1 %v2755_v48 }
  0xf0   : > { %1745 = vmatpush1.bf16.msra.mxu0 %v2753_v49 }
  0xf1   : > { %1746 = vmatprep.subr.bf16.mxu0 %v2758_v50 }
  0xf2   : > { %2464 = vmatpush1.bf16.msra.mxu1 %v2753_v49 }
  0xf3   : > { %953 = vmatmul.mubr.bf16.gmra.mxu0 %v2722_v35  ;;  %2449 = vmatprep.subr.bf16.mxu1 %v2758_v50 }
  0xf4   : > { %962 = vmatprep.mubr.bf16.mxu0 %v2723_v36  ;;  %1747 = vmatpush2.bf16.msra.mxu0 %v2756_v51 }
  0xf5   : > { %1066 = vmatmul.mubr.bf16.gmra.mxu1 %v2722_v35  ;;  %1748 = vmatprep.subr.bf16.mxu0 %v2761_v52 }
  0xf6   : > { %1075 = vmatprep.mubr.bf16.mxu1 %v2723_v36  ;;  %2465 = vmatpush2.bf16.msra.mxu1 %v2756_v51 }
  0xf7   : > { %2450 = vmatprep.subr.bf16.mxu1 %v2761_v52 }
  0xf8   : > { %1749 = vmatpush2.bf16.msra.mxu0 %v2759_v53 }
  0xf9   : > { %1750 = vmatprep.subr.bf16.mxu0 %v2764_v54 }
  0xfa   : > { %2466 = vmatpush2.bf16.msra.mxu1 %v2759_v53 }
  0xfb   : > { %963 = vmatmul.mubr.bf16.gmra.mxu0 %v2725_v37  ;;  %2451 = vmatprep.subr.bf16.mxu1 %v2764_v54 }
  0xfc   : > { %972 = vmatprep.mubr.bf16.mxu0 %v2726_v38  ;;  %1751 = vmatpush2.bf16.msra.mxu0 %v2762_v55 }
  0xfd   : > { %1076 = vmatmul.mubr.bf16.gmra.mxu1 %v2725_v37  ;;  %1752 = vmatprep.subr.bf16.mxu0 %v2767_v56 }
  0xfe   : > { %1085 = vmatprep.mubr.bf16.mxu1 %v2726_v38  ;;  %2467 = vmatpush2.bf16.msra.mxu1 %v2762_v55 }
  0xff   : > { %2452 = vmatprep.subr.bf16.mxu1 %v2767_v56 }
 0x100   : > { %1753 = vmatpush2.bf16.msra.mxu0 %v2765_v57 }
 0x101   : > { %1754 = vmatprep.subr.bf16.mxu0 %v2770_v58 }
 0x102   : > { %2468 = vmatpush2.bf16.msra.mxu1 %v2765_v57 }
 0x103   : > { %973 = vmatmul.mubr.bf16.gmra.mxu0 %v2728_v39  ;;  %2453 = vmatprep.subr.bf16.mxu1 %v2770_v58 }
 0x104   : > { %982 = vmatprep.mubr.bf16.mxu0 %v2729_v40  ;;  %1755 = vmatpush2.bf16.msra.mxu0 %v2768_v59 }
 0x105   : > { %1086 = vmatmul.mubr.bf16.gmra.mxu1 %v2728_v39  ;;  %1756 = vmatprep.subr.bf16.mxu0 %v2773_v60 }
 0x106   : > { %1095 = vmatprep.mubr.bf16.mxu1 %v2729_v40  ;;  %2469 = vmatpush2.bf16.msra.mxu1 %v2768_v59 }
 0x107   : > { %2454 = vmatprep.subr.bf16.mxu1 %v2773_v60 }
 0x108   : > { %1757 = vmatpush2.bf16.msra.mxu0 %v2771_v61 }
 0x109   : > { %1758 = vmatprep.subr.bf16.mxu0 %v2776_v62 }
 0x10a   : > { %2470 = vmatpush2.bf16.msra.mxu1 %v2771_v61 }
 0x10b   : > { %983 = vmatmul.mubr.bf16.gmra.mxu0 %v2731_v41  ;;  %2455 = vmatprep.subr.bf16.mxu1 %v2776_v62 }
 0x10c   : > { %1759 = vmatpush2.bf16.msra.mxu0 %v2774_v63 }
 0x10d   : > { %1096 = vmatmul.mubr.bf16.gmra.mxu1 %v2731_v41  ;;  %1760 = vmatprep.subr.bf16.mxu0 %v2779_v0 }
 0x10e   : > { %2471 = vmatpush2.bf16.msra.mxu1 %v2774_v63 }
 0x10f   : > { %2456 = vmatprep.subr.bf16.mxu1 %v2779_v0 }
 0x110   : > { %1761 = vmatpush2.bf16.msra.mxu0 %v2777_v1 }
 0x112   : > { %2472 = vmatpush2.bf16.msra.mxu1 %v2777_v1 }
 0x120   : > { %v3627_v56 = vpop.permute.xlu0 %1380 }
 0x121   : > { %v3620_v50 = vpop.permute.xlu1 %1420 }
 0x193   : > { %v3562_v2 = vpop.f32.mrf.mxu0 }
 0x194   : > { %v2334_v3 = vmul.f32 -1.442695, %v3562_v2 }
 0x195   : > { %v3565_v4 = vpop.f32.mrf.mxu0  ;;  %v3580_v14 = vpop.f32.mrf.mxu1 }
 0x196   : > { %2780 = vpow2.f32 %v2334_v3  ;;  %v2335_v5 = vmul.f32 -1.442695, %v3565_v4 }
 0x197   : > { %v3568_v6 = vpop.f32.mrf.mxu0  ;;  %v3585_v17 = vpop.f32.mrf.mxu1 }
 0x198   : > { %2782 = vpow2.f32 %v2335_v5  ;;  %v2336_v7 = vmul.f32 -1.442695, %v3568_v6 }
 0x199   : > { %v3571_v8 = vpop.f32.mrf.mxu0  ;;  %v3590_v20 = vpop.f32.mrf.mxu1 }
 0x19a   : > { %2784 = vpow2.f32 %v2336_v7  ;;  %v2337_v9 = vmul.f32 -1.442695, %v3571_v8  ;;  %v3640_v7 = vpop.permute.xlu1 %1425 }
 0x19b   : > { %v3574_v10 = vpop.f32.mrf.mxu0  ;;  %v3595_v25 = vpop.f32.mrf.mxu1 }
 0x19c   : > { %2786 = vpow2.f32 %v2337_v9  ;;  %v2338_v11 = vmul.f32 -1.442695, %v3574_v10 }
 0x19d   : > { %v3577_v12 = vpop.f32.mrf.mxu0  ;;  %v3600_v30 = vpop.f32.mrf.mxu1 }
 0x19e   : > { %2788 = vpow2.f32 %v2338_v11  ;;  %v2339_v13 = vmul.f32 -1.442695, %v3577_v12 }
 0x19f   : > { %v3582_v15 = vpop.f32.mrf.mxu0  ;;  %v3605_v35 = vpop.f32.mrf.mxu1 }
 0x1a0   : > { %2790 = vpow2.f32 %v2339_v13  ;;  %v2340_v16 = vmul.f32 -1.442695, %v3582_v15 }
 0x1a1   : > { %v3587_v18 = vpop.f32.mrf.mxu0  ;;  %v3610_v40 = vpop.f32.mrf.mxu1 }
 0x1a2   : > { %2792 = vpow2.f32 %v2340_v16  ;;  %v2341_v19 = vmul.f32 -1.442695, %v3587_v18 }
 0x1a3   : > { %v2781_v21 = vpop.eup %2780  ;;  %v3592_v22 = vpop.f32.mrf.mxu0 }
 0x1a4   : > { %v1202_v23 = vadd.f32 1.0, %v2781_v21  ;;  %2794 = vpow2.f32 %v2341_v19  ;;  %v2342_v24 = vmul.f32 -1.442695, %v3592_v22  ;;  %v3615_v45 = vpop.f32.mrf.mxu1 }
 0x1a5   : > { %v2783_v26 = vpop.eup %2782  ;;  %v3597_v27 = vpop.f32.mrf.mxu0 }
 0x1a6   : > { %2796 = vrcp.f32 %v1202_v23  ;;  %v1203_v28 = vadd.f32 1.0, %v2783_v26  ;;  %v2343_v29 = vmul.f32 -1.442695, %v3597_v27  ;;  %v3622_v51 = vpop.f32.mrf.mxu1 }
 0x1a7   : > { %v2785_v31 = vpop.eup %2784  ;;  %2798 = vpow2.f32 %v2342_v24  ;;  %v3602_v32 = vpop.f32.mrf.mxu0 }
 0x1a8   : > { %2800 = vrcp.f32 %v1203_v28  ;;  %v1204_v33 = vadd.f32 1.0, %v2785_v31  ;;  %v2344_v34 = vmul.f32 -1.442695, %v3602_v32  ;;  %v3629_v57 = vpop.f32.mrf.mxu1  ;;  %v1386_v24 = vpop.permute.xlu0 %1385 }
 0x1a9   : > { %v2787_v36 = vpop.eup %2786  ;;  %2802 = vpow2.f32 %v2343_v29  ;;  %v3607_v37 = vpop.f32.mrf.mxu0 }
 0x1aa   : > { %2804 = vrcp.f32 %v1204_v33  ;;  %v1205_v38 = vadd.f32 1.0, %v2787_v36  ;;  %v2345_v39 = vmul.f32 -1.442695, %v3607_v37  ;;  %v3634_v62 = vpop.f32.mrf.mxu1 }
 0x1ab   : > { %v2789_v41 = vpop.eup %2788  ;;  %2806 = vpow2.f32 %v2344_v34  ;;  %v3612_v42 = vpop.f32.mrf.mxu0 }
 0x1ac   : > { %2808 = vrcp.f32 %v1205_v38  ;;  %v1206_v43 = vadd.f32 1.0, %v2789_v41  ;;  %v2346_v44 = vmul.f32 -1.442695, %v3612_v42  ;;  %v3642_v9 = vpop.f32.mrf.mxu1 }
 0x1ad   : > { %v2791_v46 = vpop.eup %2790  ;;  %2810 = vpow2.f32 %v2345_v39  ;;  %v3617_v47 = vpop.f32.mrf.mxu0 }
 0x1ae   : > { %2812 = vrcp.f32 %v1206_v43  ;;  %v1207_v48 = vadd.f32 1.0, %v2791_v46  ;;  %v2347_v49 = vmul.f32 -1.442695, %v3617_v47 }
 0x1af   : > { %v2793_v52 = vpop.eup %2792  ;;  %2814 = vpow2.f32 %v2346_v44  ;;  %v3624_v53 = vpop.f32.mrf.mxu0 }
 0x1b0   : > { %2816 = vrcp.f32 %v1207_v48  ;;  %v1208_v54 = vadd.f32 1.0, %v2793_v52  ;;  %v2348_v55 = vmul.f32 -1.442695, %v3624_v53 }
 0x1b1   : > { %v2795_v58 = vpop.eup %2794  ;;  %2818 = vpow2.f32 %v2347_v49  ;;  %v3631_v59 = vpop.f32.mrf.mxu0 }
 0x1b2   : > { %2820 = vrcp.f32 %v1208_v54  ;;  %v1209_v60 = vadd.f32 1.0, %v2795_v58  ;;  %v2349_v61 = vmul.f32 -1.442695, %v3631_v59 }
 0x1b3   : > { %v2797_v63 = vpop.eup %2796  ;;  %2822 = vpow2.f32 %v2348_v55  ;;  %v3636_v0 = vpop.f32.mrf.mxu0 }
 0x1b4   : > { %v2799_v1 = vpop.eup %2798  ;;  %v1298_v3 = vmul.f32 %v2797_v63, %v3562_v2  ;;  %2824 = vrcp.f32 %v1209_v60  ;;  %v2350_v5 = vmul.f32 -1.442695, %v3636_v0  ;;  %v3648_v2 = vpop.f32.mrf.mxu1 }
 0x1b5   : > { %v2801_v11 = vpop.eup %2800  ;;  %v1210_v13 = vadd.f32 1.0, %v2799_v1  ;;  %2826 = vpow2.f32 %v2349_v61  ;;  %v3644_v16 = vpop.f32.mrf.mxu0 }
 0x1b6   : > { %v2803_v19 = vpop.eup %2802  ;;  %v1299_v21 = vmul.f32 %v2801_v11, %v3565_v4  ;;  %2828 = vpow2.f32 %v2350_v5  ;;  %v2351_v23 = vmul.f32 -1.442695, %v3644_v16  ;;  %v1330_v34 = vmul.f32 %v1298_v3, %v3580_v14  ;;  %v3654_v36 = vpop.f32.mrf.mxu1 }
 0x1b7   : > { %v2805_v26 = vpop.eup %2804  ;;  %2830 = vrcp.f32 %v1210_v13  ;;  %v1211_v28 = vadd.f32 1.0, %v2803_v19  ;;  %v3650_v29 = vpop.f32.mrf.mxu0 }
 0x1b8   : > { %v2807_v31 = vpop.eup %2806  ;;  %v1300_v33 = vmul.f32 %v2805_v26, %v3568_v6  ;;  %2832 = vpow2.f32 %v2351_v23  ;;  %v2352_v39 = vmul.f32 -1.442695, %v3650_v29  ;;  %v1331_v46 = vmul.f32 %v1299_v21, %v3585_v17  ;;  %v3663_v14 = vpop.permute.xlu1 %1395 }
 0x1b9   : > { %v2809_v4 = vpop.eup %2808  ;;  %2834 = vrcp.f32 %v1211_v28  ;;  %v1212_v38 = vadd.f32 1.0, %v2807_v31  ;;  %v3657_v41 = vpop.f32.mrf.mxu0 }
 0x1ba   : > { %v2811_v43 = vpop.eup %2810  ;;  %v1301_v44 = vmul.f32 %v2809_v4, %v3571_v8  ;;  %v1332_v48 = vmul.f32 %v1300_v33, %v3590_v20  ;;  %v2353_v6 = vmul.f32 -1.442695, %v3657_v41  ;;  %v3665_v49 = vpop.f32.mrf.mxu1  ;;  %v1458_v8 = vmul.f32 %v3627_v56, %v1330_v34 }
 0x1bb   : > { %v2813_v52 = vpop.eup %2812  ;;  %2836 = vrcp.f32 %v1212_v38  ;;  %v1213_v54 = vadd.f32 1.0, %v2811_v43  ;;  %v3667_v55 = vpop.f32.mrf.mxu0 }
 0x1bc   : > { %v2815_v58 = vpop.eup %2814  ;;  %v1333_v60 = vmul.f32 %v1301_v44, %v3595_v25  ;;  %2838 = vpow2.f32 %v2352_v39  ;;  %v3671_v17 = vpop.permute.xlu0 %1390  ;;  %v1460_v1 = vmul.f32 %v1386_v24, %v1332_v48  ;;  %v2354_v3 = vmul.f32 -1.442695, %v3667_v55 }
 0x1bd   : > { %v3673_v20 = vpop.f32.mrf.mxu1  ;;  %v2817_v61 = vpop.eup %2816  ;;  %2840 = vrcp.f32 %v1213_v54  ;;  %v1214_v63 = vadd.f32 1.0, %v2815_v58  ;;  %v1459_v25 = vmul.f32 %v3627_v56, %v1331_v46  ;;  %v1302_v26 = vmul.f32 %v2813_v52, %v3574_v10 }
 0x1be   : > { %v3676_v5 = vpop.f32.mrf.mxu0  ;;  %v2819_v11 = vpop.eup %2818  ;;  %v1303_v13 = vmul.f32 %v2817_v61, %v3577_v12  ;;  %2842 = vpow2.f32 %v2353_v6  ;;  %v1461_v19 = vmul.f32 %v1386_v24, %v1333_v60  ;;  %v1490_v43 = vpack.c.bf16 %v1460_v1, %v1458_v8 }
 0x1bf   : > { %v3680_v21 = vpop.f32.mrf.mxu1  ;;  %v2821_v23 = vpop.eup %2820  ;;  %2844 = vrcp.f32 %v1214_v63  ;;  %v1215_v28 = vadd.f32 1.0, %v2819_v11  ;;  %v2355_v31 = vmul.f32 -1.442695, %v3676_v5  ;;  %v1334_v8 = vmul.f32 %v1302_v26, %v3600_v30 }
 0x1c0   : > { %v3684_v33 = vpop.f32.mrf.mxu0  ;;  %v2823_v34 = vpop.eup %2822  ;;  %v1304_v4 = vmul.f32 %v2821_v23, %v3582_v15  ;;  %v1491_v38 = vpack.c.bf16 %v1461_v19, %v1459_v25  ;;  %2846 = vpow2.f32 %v2354_v3  ;;  %v1335_v6 = vmul.f32 %v1303_v13, %v3605_v35 }
 0x1c1   : > { %v3687_v12 = vpop.permute.xlu1 %1435  ;;  %v3689_v56 = vpop.f32.mrf.mxu1  ;;  %2848 = vrcp.f32 %v1215_v28  ;;  %v1216_v39 = vadd.f32 1.0, %v2823_v34  ;;  %v2356_v10 = vmul.f32 -1.442695, %v3684_v33 }
 0x1c2   : > { %v2825_v24 = vpop.eup %2824  ;;  %v3692_v44 = vpop.f32.mrf.mxu0  ;;  %v1336_v15 = vmul.f32 %v1304_v4, %v3610_v40  ;;  %2850 = vpow2.f32 %v2355_v31  ;;  %1762 = vmatprep.mubr.bf16.mxu0 %v1491_v38  ;;  %v1463_v23 = vmul.f32 %v3671_v17, %v1335_v6  ;;  %v1462_v31 = vmul.f32 %v3671_v17, %v1334_v8 }
 0x1c3   : > { %v2827_v46 = vpop.eup %2826  ;;  %v1305_v48 = vmul.f32 %v2825_v24, %v3587_v18  ;;  %v3697_v52 = vpop.permute.xlu0 %1430  ;;  %2852 = vrcp.f32 %v1216_v39  ;;  %v2357_v61 = vmul.f32 -1.442695, %v3692_v44  ;;  %1763 = vmatmul.mubr.bf16.vlgmr.msra.gmra.mxu0 %v1490_v43 }
 0x1c4   : > { %v3699_v54 = vpop.f32.mrf.mxu1  ;;  %v2829_v58 = vpop.eup %2828  ;;  %v1217_v60 = vadd.f32 1.0, %v2827_v46  ;;  %2854 = vpow2.f32 %v2356_v10  ;;  %v1464_v3 = vmul.f32 %v3663_v14, %v1336_v15 }
 0x1c5   : > { %v3703_v63 = vpop.f32.mrf.mxu0  ;;  %v2831_v18 = vpop.eup %2830  ;;  %v1218_v35 = vadd.f32 1.0, %v2829_v58  ;;  %v1337_v40 = vmul.f32 %v1305_v48, %v3615_v45 }
 0x1c6   : > { %v2833_v1 = vpop.eup %2832  ;;  %2856 = vrcp.f32 %v1217_v60  ;;  %v2358_v11 = vmul.f32 -1.442695, %v3703_v63  ;;  %v3710_v25 = vpop.f32.mrf.mxu1  ;;  %v1306_v24 = vmul.f32 %v2831_v18, %v3592_v22  ;;  %v1492_v48 = vpack.c.bf16 %v1464_v3, %v1462_v31 }
 0x1c7   : > { %v3708_v13 = vpop.f32.mrf.mxu0  ;;  %v2835_v30 = vpop.eup %2834  ;;  %2858 = vrcp.f32 %v1218_v35  ;;  %v1219_v19 = vadd.f32 1.0, %v2833_v1  ;;  %v1465_v26 = vmul.f32 %v3663_v14, %v1337_v40 }
 0x1c8   : > { %v1406_v28 = vpop.permute.xlu1 %1405  ;;  %v1307_v45 = vmul.f32 %v2835_v30, %v3597_v27  ;;  %2860 = vpow2.f32 %v2357_v61  ;;  %v2359_v34 = vmul.f32 -1.442695, %v3708_v13  ;;  %v2837_v38 = vpop.eup %2836  ;;  %v1338_v40 = vmul.f32 %v1306_v24, %v3622_v51 }
 0x1c9   : > { %v3717_v4 = vpop.f32.mrf.mxu0  ;;  %2862 = vrcp.f32 %v1219_v19  ;;  %v1493_v39 = vpack.c.bf16 %v1465_v26, %v1463_v23  ;;  %v1401_v43 = vpop.permute.xlu0 %1400  ;;  %v1308_v14 = vmul.f32 %v2837_v38, %v3602_v32 }
 0x1ca   : > { %v2360_v10 = vmul.f32 -1.442695, %v3717_v4  ;;  %v2839_v46 = vpop.eup %2838  ;;  %2864 = vpow2.f32 %v2358_v11  ;;  %v3724_v17 = vpop.f32.mrf.mxu1  ;;  %v1339_v8 = vmul.f32 %v1307_v45, %v3629_v57 }
 0x1cb   : > { %v3722_v27 = vpop.f32.mrf.mxu0  ;;  %v2841_v6 = vpop.eup %2840  ;;  %v1220_v15 = vadd.f32 1.0, %v2839_v46  ;;  %2866 = vpow2.f32 %v2359_v34  ;;  %1772 = vmatprep.mubr.bf16.mxu0 %v1493_v39  ;;  %v1340_v61 = vmul.f32 %v1308_v14, %v3634_v62  ;;  %v1466_v46 = vmul.f32 %v1401_v43, %v1338_v40 }
 0x1cc   : > { %v2361_v58 = vmul.f32 -1.442695, %v3722_v27  ;;  %v2843_v22 = vpop.eup %2842  ;;  %v1309_v60 = vmul.f32 %v2841_v6, %v3607_v37  ;;  %2868 = vpow2.f32 %v2360_v10  ;;  %1773 = vmatmul.mubr.bf16.gmra.mxu0 %v1492_v48  ;;  %v3733_v1 = vpop.permute.xlu1 %1445  ;;  %v1467_v51 = vmul.f32 %v1401_v43, %v1339_v8 }
 0x1cd   : > { %v3730_v32 = vpop.f32.mrf.mxu0  ;;  %v2845_v18 = vpop.eup %2844  ;;  %2870 = vrcp.f32 %v1220_v15  ;;  %v1221_v35 = vadd.f32 1.0, %v2843_v22  ;;  %v1468_v23 = vmul.f32 %v1406_v28, %v1340_v61 }
 0x1ce   : > { %v2847_v3 = vpop.eup %2846  ;;  %v1341_v11 = vmul.f32 %v1309_v60, %v3642_v9  ;;  %2872 = vpow2.f32 %v2361_v58  ;;  %v2362_v37 = vmul.f32 -1.442695, %v3730_v32  ;;  %v3739_v62 = vpop.f32.mrf.mxu1  ;;  %v1310_v39 = vmul.f32 %v2845_v18, %v3612_v42 }
 0x1cf   : > { %v3737_v57 = vpop.f32.mrf.mxu0  ;;  %v2849_v30 = vpop.eup %2848  ;;  %2874 = vrcp.f32 %v1221_v35  ;;  %v1222_v19 = vadd.f32 1.0, %v2847_v3  ;;  %v1494_v60 = vpack.c.bf16 %v1468_v23, %v1466_v46 }
 0x1d0   : > { %v2851_v26 = vpop.eup %2850  ;;  %v1311_v45 = vmul.f32 %v2849_v30, %v3617_v47  ;;  %v1469_v31 = vmul.f32 %v1406_v28, %v1341_v11  ;;  %v3742_v34 = vpop.permute.xlu0 %1440  ;;  %v2363_v9 = vmul.f32 -1.442695, %v3737_v57  ;;  %v1342_v40 = vmul.f32 %v1310_v39, %v3648_v2 }
 0x1d1   : > { %v3745_v38 = vpop.f32.mrf.mxu0  ;;  %v2853_v24 = vpop.eup %2852  ;;  %2876 = vrcp.f32 %v1222_v19  ;;  %v1223_v10 = vadd.f32 1.0, %v2851_v26 }
 0x1d2   : > { %v2855_v14 = vpop.eup %2854  ;;  %v1312_v48 = vmul.f32 %v2853_v24, %v3624_v53  ;;  %v1495_v6 = vpack.c.bf16 %v1469_v31, %v1467_v51  ;;  %2878 = vpow2.f32 %v2362_v37  ;;  %v2364_v47 = vmul.f32 -1.442695, %v3745_v38  ;;  %v3752_v15 = vpop.f32.mrf.mxu1 }
 0x1d3   : > { %v3750_v28 = vpop.f32.mrf.mxu0  ;;  %v2857_v58 = vpop.eup %2856  ;;  %2880 = vrcp.f32 %v1223_v10  ;;  %v1224_v22 = vadd.f32 1.0, %v2855_v14  ;;  %v1343_v61 = vmul.f32 %v1311_v45, %v3654_v36 }
 0x1d4   : > { %v2365_v42 = vmul.f32 -1.442695, %v3750_v28  ;;  %v2859_v8 = vpop.eup %2858  ;;  %v1313_v43 = vmul.f32 %v2857_v58, %v3631_v59  ;;  %v1344_v53 = vmul.f32 %v1312_v48, %v3665_v49  ;;  %2882 = vpow2.f32 %v2363_v9  ;;  %1782 = vmatprep.mubr.bf16.mxu0 %v1495_v6  ;;  %v1416_v18 = vpop.permute.xlu1 %1415 }
 0x1d5   : > { %v2861_v35 = vpop.eup %2860  ;;  %2884 = vrcp.f32 %v1224_v22  ;;  %1783 = vmatmul.mubr.bf16.gmra.mxu0 %v1494_v60  ;;  %v1411_v30 = vpop.permute.xlu0 %1410 }
 0x1d6   : > { %v2863_v3 = vpop.eup %2862  ;;  %v1225_v11 = vadd.f32 1.0, %v2861_v35  ;;  %v1345_v37 = vmul.f32 %v1313_v43, %v3673_v20  ;;  %2886 = vpow2.f32 %v2364_v47  ;;  %v3760_v19 = vpop.f32.mrf.mxu1  ;;  %v1472_v36 = vmul.f32 %v1416_v18, %v1344_v53 }
 0x1d7   : > { %v2865_v59 = vpop.eup %2864  ;;  %2888 = vpow2.f32 %v2365_v42  ;;  %v1471_v26 = vmul.f32 %v1411_v30, %v1343_v61  ;;  %v1315_v2 = vmul.f32 %v2863_v3, %v3644_v16  ;;  %v1470_v9 = vmul.f32 %v1411_v30, %v1342_v40 }
 0x1d8   : > { %v2867_v49 = vpop.eup %2866  ;;  %2890 = vrcp.f32 %v1225_v11  ;;  %v1226_v23 = vadd.f32 1.0, %v2865_v59  ;;  %v1473_v45 = vmul.f32 %v1416_v18, %v1345_v37  ;;  %v1314_v20 = vmul.f32 %v2859_v8, %v3636_v0  ;;  %v3764_v46 = vpop.f32.mrf.mxu1 }
 0x1d9   : > { %v2869_v51 = vpop.eup %2868  ;;  %v1227_v31 = vadd.f32 1.0, %v2867_v49  ;;  %v1496_v6 = vpack.c.bf16 %v1472_v36, %v1470_v9  ;;  %v1347_v22 = vmul.f32 %v1315_v2, %v3689_v56 }
 0x1da   : > { %v2871_v24 = vpop.eup %2870  ;;  %2892 = vrcp.f32 %v1226_v23  ;;  %v1228_v39 = vadd.f32 1.0, %v2869_v51  ;;  %v1497_v10 = vpack.c.bf16 %v1473_v45, %v1471_v26  ;;  %v1346_v42 = vmul.f32 %v1314_v20, %v3680_v21  ;;  %v1089_v8 = vpop.f32.mrf.mxu1 }
 0x1db   : > { %v2873_v14 = vpop.eup %2872  ;;  %v1316_v48 = vmul.f32 %v2871_v24, %v3650_v29  ;;  %2894 = vrcp.f32 %v1227_v31 }
 0x1dc   : > { %v2875_v47 = vpop.eup %2874  ;;  %2896 = vrcp.f32 %v1228_v39  ;;  %v1229_v58 = vadd.f32 1.0, %v2873_v14  ;;  %1792 = vmatprep.mubr.bf16.mxu0 %v1497_v10  ;;  %v1474_v11 = vmul.f32 %v3620_v50, %v1346_v42  ;;  %v1091_v21 = vpop.f32.mrf.mxu1 }
 0x1dd   : > { %v1317_v16 = vmul.f32 %v2875_v47, %v3657_v41  ;;  %v1348_v0 = vmul.f32 %v1316_v48, %v3699_v54  ;;  %1793 = vmatmul.mubr.bf16.gmra.mxu0 %v1496_v6  ;;  %v1475_v41 = vmul.f32 %v3620_v50, %v1347_v22 }
 0x1de   : > { %v2877_v60 = vpop.eup %2876  ;;  %2898 = vrcp.f32 %v1229_v58 }
 0x1df   : > { %v2879_v43 = vpop.eup %2878  ;;  %v1349_v29 = vmul.f32 %v1317_v16, %v3710_v25  ;;  %v1476_v18 = vmul.f32 %v3640_v7, %v1348_v0  ;;  %v1318_v30 = vmul.f32 %v2877_v60, %v3667_v55  ;;  %v1093_v55 = vpop.f32.mrf.mxu1 }
 0x1e0   : > { %v2881_v61 = vpop.eup %2880  ;;  %v1230_v53 = vadd.f32 1.0, %v2879_v43 }
 0x1e1   : > { %v2883_v35 = vpop.eup %2882  ;;  %v1477_v56 = vmul.f32 %v3640_v7, %v1349_v29  ;;  %v1319_v54 = vmul.f32 %v2881_v61, %v3676_v5  ;;  %v1498_v23 = vpack.c.bf16 %v1476_v18, %v1474_v11  ;;  %v1097_v39 = vpop.f32.mrf.mxu1 }
 0x1e2   : > { %v2885_v40 = vpop.eup %2884  ;;  %v1231_v3 = vadd.f32 1.0, %v2883_v35  ;;  %2900 = vrcp.f32 %v1230_v53 }
 0x1e3   : > { %v2887_v37 = vpop.eup %2886  ;;  %v1320_v25 = vmul.f32 %v2885_v40, %v3684_v33  ;;  %v1499_v59 = vpack.c.bf16 %v1477_v56, %v1475_v41  ;;  %v1351_v50 = vmul.f32 %v1319_v54, %v3739_v62  ;;  %v1350_v33 = vmul.f32 %v1318_v30, %v3724_v17  ;;  %v1099_v16 = vpop.f32.mrf.mxu1  ;;  %v1507_v30 = vld [vmem:[#allocation2] sm:$0xff] }
 0x1e4   : > { %v2889_v36 = vpop.eup %2888  ;;  %2902 = vrcp.f32 %v1231_v3  ;;  %v1232_v49 = vadd.f32 1.0, %v2887_v37  ;;  %v1456_v40 = vpop.permute.xlu1 %1455 }
 0x1e5   : > { %v2891_v26 = vpop.eup %2890  ;;  %v1233_v7 = vadd.f32 1.0, %v2889_v36  ;;  %v1352_v45 = vmul.f32 %v1320_v25, %v3752_v15  ;;  %1802 = vmatprep.mubr.bf16.mxu1 %v1499_v59  ;;  %v1478_v17 = vmul.f32 %v3697_v52, %v1350_v33  ;;  %v1101_v60 = vpop.f32.mrf.mxu1  ;;  %v1508_v36 = vld [vmem:[#allocation2 + $0xd8] sm:$0xff] }
 0x1e6   : > { %v1321_v5 = vmul.f32 %v2891_v26, %v3692_v44  ;;  %2904 = vrcp.f32 %v1232_v49  ;;  %1803 = vmatmul.mubr.bf16.vlgmr.msra.gmra.mxu1 %v1498_v23  ;;  %v1479_v44 = vmul.f32 %v3697_v52, %v1351_v50  ;;  %v1451_v54 = vpop.permute.xlu0 %1450  ;;  %v1509_v26 = vld [vmem:[#allocation2 + $0x18] sm:$0xff] }
 0x1e7   : > { %v2893_v51 = vpop.eup %2892  ;;  %2906 = vrcp.f32 %v1233_v7  ;;  %v1480_v15 = vmul.f32 %v3687_v12, %v1352_v45 }
 0x1e8   : > { %v2895_v2 = vpop.eup %2894  ;;  %v1353_v31 = vmul.f32 %v1321_v5, %v3760_v19  ;;  %v1322_v14 = vmul.f32 %v2893_v51, %v3703_v63  ;;  %v1510_v5 = vld [vmem:[#allocation2 + $0x50] sm:$0xff]  ;;  %v1511_v51 = vld [vmem:[#allocation2 + $0x68] sm:$0xff] }
 0x1e9   : > { %v2897_v9 = vpop.eup %2896  ;;  %v1323_v24 = vmul.f32 %v2895_v2, %v3708_v13  ;;  %v1500_v13 = vpack.c.bf16 %v1480_v15, %v1478_v17  ;;  %v1513_v15 = vld [vmem:[#allocation2 + $0x48] sm:$0xff] }
 0x1ea   : > { %v1324_v20 = vmul.f32 %v2897_v9, %v3717_v4  ;;  %v1481_v62 = vmul.f32 %v3687_v12, %v1353_v31  ;;  %v1354_v4 = vmul.f32 %v1322_v14, %v3764_v46  ;;  %v1512_v31 = vld [vmem:[#allocation2 + $0x30] sm:$0xff]  ;;  %v1515_v14 = vld [vmem:[#allocation2 + $0x88] sm:$0xff] }
 0x1eb   : > { %v2899_v10 = vpop.eup %2898  ;;  %v1355_v19 = vmul.f32 %v1323_v24, %v1089_v8 }
 0x1ec   : > { %v1325_v48 = vmul.f32 %v2899_v10, %v3722_v27  ;;  %v1501_v6 = vpack.c.bf16 %v1481_v62, %v1479_v44  ;;  %v1356_v47 = vmul.f32 %v1324_v20, %v1091_v21  ;;  %v1482_v29 = vmul.f32 %v3742_v34, %v1354_v4  ;;  %v1518_v4 = vld [vmem:[#allocation2 + $0x60] sm:$0xff] }
 0x1ed   : > { %v1483_v12 = vmul.f32 %v3742_v34, %v1355_v19  ;;  %v1516_v19 = vld [vmem:[#allocation2 + $0xe8] sm:$0xff] }
 0x1ee   : > { %v1357_v58 = vmul.f32 %v1325_v48, %v1093_v55  ;;  %1812 = vmatprep.mubr.bf16.mxu1 %v1501_v6  ;;  %v1484_v52 = vmul.f32 %v3733_v1, %v1356_v47 }
 0x1ef   : > { %1813 = vmatmul.mubr.bf16.gmra.mxu1 %v1500_v13  ;;  %v2901_v22 = vpop.eup %2900  ;;  %v1517_v13 = vld [vmem:[#allocation2 + $0xb8] sm:$0xff] }
 0x1f0   : > { %v1485_v0 = vmul.f32 %v3733_v1, %v1357_v58  ;;  %v1326_v43 = vmul.f32 %v2901_v22, %v3730_v32  ;;  %v1502_v35 = vpack.c.bf16 %v1484_v52, %v1482_v29  ;;  %v1103_v1 = vpop.f32.mrf.mxu1 }
 0x1f1   : > { %v2903_v63 = vpop.eup %2902 }
 0x1f2   : > { %v1327_v27 = vmul.f32 %v2903_v63, %v3737_v57  ;;  %v1503_v42 = vpack.c.bf16 %v1485_v0, %v1483_v12  ;;  %v1358_v57 = vmul.f32 %v1326_v43, %v1097_v39  ;;  %v1514_v39 = vld [vmem:[#allocation2 + $0x80] sm:$0xff]  ;;  %v1519_v0 = vld [vmem:[#allocation2 + $0xf0] sm:$0xff] }
 0x1f3   : > { %v2905_v8 = vpop.eup %2904 }
 0x1f4   : > { %v2907_v61 = vpop.eup %2906  ;;  %v1328_v46 = vmul.f32 %v2905_v8, %v3745_v38  ;;  %1822 = vmatprep.mubr.bf16.mxu1 %v1503_v42  ;;  %v1359_v18 = vmul.f32 %v1327_v27, %v1099_v16  ;;  %v1486_v11 = vmul.f32 %v1451_v54, %v1358_v57  ;;  %v1520_v27 = vld [vmem:[#allocation2 + $0x8] sm:$0xff]  ;;  %v1521_v8 = vld [vmem:[#allocation2 + $0x78] sm:$0xff] }
 0x1f5   : > { %v1329_v53 = vmul.f32 %v2907_v61, %v3750_v28  ;;  %v1506_v28 = vld [vmem:[#allocation2 + $0xb0] sm:$0xff] }
 0x1f6   : > { %v1360_v41 = vmul.f32 %v1328_v46, %v1101_v60  ;;  %v1487_v32 = vmul.f32 %v1451_v54, %v1359_v18  ;;  %v1522_v46 = vld [vmem:[#allocation2 + $0x38] sm:$0xff] }
 0x1f7   : > { %v1361_v56 = vmul.f32 %v1329_v53, %v1103_v1  ;;  %1823 = vmatmul.mubr.bf16.gmra.mxu1 %v1502_v35  ;;  %v1523_v18 = vld [vmem:[#allocation2 + $0x58] sm:$0xff]  ;;  %v1524_v1 = vld [vmem:[#allocation2 + $0x40] sm:$0xff] }
 0x1f8   : > { %v1488_v3 = vmul.f32 %v1456_v40, %v1360_v41 }
 0x1f9   : > { %v1489_v34 = vmul.f32 %v1456_v40, %v1361_v56  ;;  %v1525_v40 = vld [vmem:[#allocation2 + $0xc8] sm:$0xff] }
 0x1fa   : > { %v1504_v38 = vpack.c.bf16 %v1488_v3, %v1486_v11 }
 0x1fb   : > { %v1505_v21 = vpack.c.bf16 %v1489_v34, %v1487_v32  ;;  %v1526_v34 = vld [vmem:[#allocation2 + $0xe0] sm:$0xff] }
 0x1fd   : > { %1832 = vmatprep.mubr.bf16.mxu1 %v1505_v21  ;;  %v1527_v21 = vld [vmem:[#allocation2 + $0x90] sm:$0xff] }
 0x1ff   : > { %1833 = vmatmul.mubr.bf16.gmra.mxu1 %v1504_v38 }
 0x283   : > { %v1764_v37 = vpop.f32.mrf.mxu0 }
 0x284   : > { %v1843_v25 = vadd.f32 %v1764_v37, %v1506_v28  ;;  %v1528_v37 = vld [vmem:[#allocation2 + $0x70] sm:$0xff] }
 0x285   : > { %v1766_v59 = vpop.f32.mrf.mxu0 }
 0x286   : > { %1875 = vst [vmem:[#allocation2 + $0xb0] sm:$0xff] %v1843_v25  ;;  %v1844_v49 = vadd.f32 %v1766_v59, %v1507_v30  ;;  %v1529_v59 = vld [vmem:[#allocation2 + $0xc0] sm:$0xff] }
 0x287   : > { %v1768_v23 = vpop.f32.mrf.mxu0 }
 0x288   : > { %1876 = vst [vmem:[#allocation2] sm:$0xff] %v1844_v49  ;;  %v1845_v7 = vadd.f32 %v1768_v23, %v1508_v36  ;;  %v1530_v23 = vld [vmem:[#allocation2 + $0xa8] sm:$0xff] }
 0x289   : > { %v1770_v45 = vpop.f32.mrf.mxu0 }
 0x28a   : > { %1877 = vst [vmem:[#allocation2 + $0xd8] sm:$0xff] %v1845_v7  ;;  %v1846_v50 = vadd.f32 %v1770_v45, %v1509_v26  ;;  %v1531_v45 = vld [vmem:[#allocation2 + $0xd0] sm:$0xff] }
 0x28c   : > { %v1774_v55 = vpop.f32.mrf.mxu0  ;;  %1878 = vst [vmem:[#allocation2 + $0x18] sm:$0xff] %v1846_v50 }
 0x28d   : > { %v1847_v33 = vadd.f32 %v1774_v55, %v1510_v5  ;;  %v1532_v55 = vld [vmem:[#allocation2 + $0x10] sm:$0xff] }
 0x28e   : > { %v1776_v2 = vpop.f32.mrf.mxu0 }
 0x28f   : > { %1879 = vst [vmem:[#allocation2 + $0x50] sm:$0xff] %v1847_v33  ;;  %v1848_v9 = vadd.f32 %v1776_v2, %v1511_v51  ;;  %v1533_v2 = vld [vmem:[#allocation2 + $0x28] sm:$0xff] }
 0x290   : > { %v1778_v24 = vpop.f32.mrf.mxu0 }
 0x291   : > { %1880 = vst [vmem:[#allocation2 + $0x68] sm:$0xff] %v1848_v9  ;;  %v1849_v20 = vadd.f32 %v1778_v24, %v1512_v31  ;;  %v1534_v24 = vld [vmem:[#allocation2 + $0xa0] sm:$0xff] }
 0x292   : > { %v1780_v44 = vpop.f32.mrf.mxu0 }
 0x293   : > { %1881 = vst [vmem:[#allocation2 + $0x30] sm:$0xff] %v1849_v20  ;;  %v1850_v62 = vadd.f32 %v1780_v44, %v1513_v15  ;;  %v1535_v44 = vld [vmem:[#allocation2 + $0xf8] sm:$0xff] }
 0x295   : > { %1882 = vst [vmem:[#allocation2 + $0x48] sm:$0xff] %v1850_v62  ;;  %v1784_v10 = vpop.f32.mrf.mxu0 }
 0x296   : > { %v1851_v17 = vadd.f32 %v1784_v10, %v1514_v39  ;;  %v1536_v10 = vld [vmem:[#allocation2 + $0x20] sm:$0xff] }
 0x297   : > { %v1786_v48 = vpop.f32.mrf.mxu0 }
 0x298   : > { %1883 = vst [vmem:[#allocation2 + $0x80] sm:$0xff] %v1851_v17  ;;  %v1852_v6 = vadd.f32 %v1786_v48, %v1515_v14  ;;  %v1537_v48 = vld [vmem:[#allocation2 + $0x98] sm:$0xff] }
 0x299   : > { %v1788_v47 = vpop.f32.mrf.mxu0 }
 0x29a   : > { %1884 = vst [vmem:[#allocation2 + $0x88] sm:$0xff] %v1852_v6  ;;  %v1853_v58 = vadd.f32 %v1788_v47, %v1516_v19 }
 0x29b   : > { %v1790_v16 = vpop.f32.mrf.mxu0 }
 0x29c   : > { %1885 = vst [vmem:[#allocation2 + $0xe8] sm:$0xff] %v1853_v58  ;;  %v1854_v22 = vadd.f32 %v1790_v16, %v1517_v13 }
 0x29d   : > { %v1794_v12 = vpop.f32.mrf.mxu0 }
 0x29e   : > { %1886 = vst [vmem:[#allocation2 + $0xb8] sm:$0xff] %v1854_v22  ;;  %v1855_v63 = vadd.f32 %v1794_v12, %v1518_v4 }
 0x29f   : > { %v1796_v52 = vpop.f32.mrf.mxu0 }
 0x2a0   : > { %1887 = vst [vmem:[#allocation2 + $0x60] sm:$0xff] %v1855_v63  ;;  %v1856_v60 = vadd.f32 %v1796_v52, %v1519_v0 }
 0x2a1   : > { %v1798_v42 = vpop.f32.mrf.mxu0 }
 0x2a2   : > { %1888 = vst [vmem:[#allocation2 + $0xf0] sm:$0xff] %v1856_v60  ;;  %v1857_v43 = vadd.f32 %v1798_v42, %v1520_v27 }
 0x2a3   : > { %v1800_v29 = vpop.f32.mrf.mxu0 }
 0x2a4   : > { %1889 = vst [vmem:[#allocation2 + $0x8] sm:$0xff] %v1857_v43  ;;  %v1858_v61 = vadd.f32 %v1800_v29, %v1521_v8 }
 0x2a6   : > { %1890 = vst [vmem:[#allocation2 + $0x78] sm:$0xff] %v1858_v61  ;;  %v1804_v53 = vpop.f32.mrf.mxu1 }
 0x2a7   : > { %v1859_v35 = vadd.f32 %v1804_v53, %v1522_v46 }
 0x2a8   : > { %v1806_v41 = vpop.f32.mrf.mxu1 }
 0x2a9   : > { %1891 = vst [vmem:[#allocation2 + $0x38] sm:$0xff] %v1859_v35  ;;  %v1860_v57 = vadd.f32 %v1806_v41, %v1523_v18 }
 0x2aa   : > { %v1808_v56 = vpop.f32.mrf.mxu1 }
 0x2ab   : > { %1892 = vst [vmem:[#allocation2 + $0x58] sm:$0xff] %v1860_v57  ;;  %v1861_v54 = vadd.f32 %v1808_v56, %v1524_v1 }
 0x2ac   : > { %v1810_v32 = vpop.f32.mrf.mxu1 }
 0x2ad   : > { %1893 = vst [vmem:[#allocation2 + $0x40] sm:$0xff] %v1861_v54  ;;  %v1862_v3 = vadd.f32 %v1810_v32, %v1525_v40 }
 0x2af   : > { %1894 = vst [vmem:[#allocation2 + $0xc8] sm:$0xff] %v1862_v3  ;;  %v1814_v11 = vpop.f32.mrf.mxu1 }
 0x2b0   : > { %v1863_v38 = vadd.f32 %v1814_v11, %v1526_v34 }
 0x2b1   : > { %v1816_v28 = vpop.f32.mrf.mxu1 }
 0x2b2   : > { %1895 = vst [vmem:[#allocation2 + $0xe0] sm:$0xff] %v1863_v38  ;;  %v1864_v30 = vadd.f32 %v1816_v28, %v1527_v21 }
 0x2b3   : > { %v1818_v25 = vpop.f32.mrf.mxu1 }
 0x2b4   : > { %1896 = vst [vmem:[#allocation2 + $0x90] sm:$0xff] %v1864_v30  ;;  %v1865_v36 = vadd.f32 %v1818_v25, %v1528_v37 }
 0x2b5   : > { %v1820_v49 = vpop.f32.mrf.mxu1 }
 0x2b6   : > { %1897 = vst [vmem:[#allocation2 + $0x70] sm:$0xff] %v1865_v36  ;;  %v1866_v26 = vadd.f32 %v1820_v49, %v1529_v59 }
 0x2b7   : > { %v1824_v7 = vpop.f32.mrf.mxu1 }
 0x2b8   : > { %1898 = vst [vmem:[#allocation2 + $0xc0] sm:$0xff] %v1866_v26  ;;  %v1867_v5 = vadd.f32 %v1824_v7, %v1530_v23 }
 0x2b9   : > { %v1826_v50 = vpop.f32.mrf.mxu1 }
 0x2ba   : > { %1899 = vst [vmem:[#allocation2 + $0xa8] sm:$0xff] %v1867_v5  ;;  %v1868_v51 = vadd.f32 %v1826_v50, %v1531_v45 }
 0x2bb   : > { %v1828_v33 = vpop.f32.mrf.mxu1 }
 0x2bc   : > { %1900 = vst [vmem:[#allocation2 + $0xd0] sm:$0xff] %v1868_v51  ;;  %v1869_v31 = vadd.f32 %v1828_v33, %v1532_v55 }
 0x2bd   : > { %v1830_v9 = vpop.f32.mrf.mxu1 }
 0x2be   : > { %1901 = vst [vmem:[#allocation2 + $0x10] sm:$0xff] %v1869_v31  ;;  %v1870_v15 = vadd.f32 %v1830_v9, %v1533_v2 }
 0x2bf   : > { %v1834_v20 = vpop.f32.mrf.mxu1 }
 0x2c0   : > { %1902 = vst [vmem:[#allocation2 + $0x28] sm:$0xff] %v1870_v15  ;;  %v1871_v62 = vadd.f32 %v1834_v20, %v1534_v24 }
 0x2c1   : > { %v1836_v39 = vpop.f32.mrf.mxu1 }
 0x2c2   : > { %1903 = vst [vmem:[#allocation2 + $0xa0] sm:$0xff] %v1871_v62  ;;  %v1872_v14 = vadd.f32 %v1836_v39, %v1535_v44 }
 0x2c3   : > { %v1838_v17 = vpop.f32.mrf.mxu1 }
 0x2c4   : > { %1904 = vst [vmem:[#allocation2 + $0xf8] sm:$0xff] %v1872_v14  ;;  %v1873_v19 = vadd.f32 %v1838_v17, %v1536_v10  ;;  %1912 = sbr.rel (%p3803_p2) target bundleno = 728 (0x2d8), region = 56 }
 0x2c5   : > { %v1840_v6 = vpop.f32.mrf.mxu1 }
 0x2c6   : > { %1905 = vst [vmem:[#allocation2 + $0x20] sm:$0xff] %v1873_v19  ;;  %v1874_v47 = vadd.f32 %v1840_v6, %v1537_v48 }
 0x2c8   : > { %1906 = vst [vmem:[#allocation2 + $0x98] sm:$0xff] %v1874_v47 }
 0x2c9   : > { %v1913_v13 = vld [vmem:[#allocation2 + $0xb0] sm:$0xff]  ;;  %v1914_v58 = vld [vmem:[#allocation2] sm:$0xff]  ;;  %v1915_v16 = vld [vmem:[#allocation2 + $0xd8] sm:$0xff] }
 0x2ca   : > { %v2423_v4 = vpack.c.bf16 %v1914_v58, %v1913_v13  ;;  %v1916_v22 = vld [vmem:[#allocation2 + $0x18] sm:$0xff]  ;;  %v1917_v12 = vld [vmem:[#allocation2 + $0x50] sm:$0xff]  ;;  %v1918_v0 = vld [vmem:[#allocation2 + $0x68] sm:$0xff] }
 0x2cb   : > { %v2424_v63 = vpack.c.bf16 %v1916_v22, %v1915_v16  ;;  %v2425_v52 = vpack.c.bf16 %v1918_v0, %v1917_v12  ;;  %v1919_v27 = vld [vmem:[#allocation2 + $0x30] sm:$0xff]  ;;  %v1920_v60 = vld [vmem:[#allocation2 + $0x48] sm:$0xff]  ;;  %v1921_v42 = vld [vmem:[#allocation2 + $0x80] sm:$0xff] }
 0x2cc   : > { %2041 = vst [vmem:[%s3432_s1] sm:$0xff] %v2423_v4  ;;  %v2426_v8 = vpack.c.bf16 %v1920_v60, %v1919_v27  ;;  %v1922_v43 = vld [vmem:[#allocation2 + $0x88] sm:$0xff]  ;;  %v1924_v61 = vld [vmem:[#allocation2 + $0xb8] sm:$0xff]  ;;  %v1925_v18 = vld [vmem:[#allocation2 + $0x60] sm:$0xff] }
 0x2cd   : > { %v1923_v29 = vld [vmem:[#allocation2 + $0xe8] sm:$0xff]  ;;  %2042 = vst [vmem:[%s3432_s1 + $0x8] sm:$0xff] %v2424_v63  ;;  %2043 = vst [vmem:[%s3432_s1 + $0x10] sm:$0xff] %v2425_v52  ;;  %v2427_v46 = vpack.c.bf16 %v1922_v43, %v1921_v42  ;;  %v1926_v35 = vld [vmem:[#allocation2 + $0xf0] sm:$0xff] }
 0x2ce   : > { %v2428_v53 = vpack.c.bf16 %v1924_v61, %v1923_v29  ;;  %v1927_v41 = vld [vmem:[#allocation2 + $0x8] sm:$0xff]  ;;  %2044 = vst [vmem:[%s3432_s1 + $0x18] sm:$0xff] %v2426_v8  ;;  %v2429_v1 = vpack.c.bf16 %v1926_v35, %v1925_v18  ;;  %v1928_v57 = vld [vmem:[#allocation2 + $0x78] sm:$0xff]  ;;  %v1931_v3 = vld [vmem:[#allocation2 + $0x40] sm:$0xff] }
 0x2cf   : > { %v1929_v56 = vld [vmem:[#allocation2 + $0x38] sm:$0xff]  ;;  %2045 = vst [vmem:[%s3432_s1 + $0x20] sm:$0xff] %v2427_v46  ;;  %v2430_v54 = vpack.c.bf16 %v1928_v57, %v1927_v41  ;;  %v1932_v34 = vld [vmem:[#allocation2 + $0xc8] sm:$0xff]  ;;  %v1933_v11 = vld [vmem:[#allocation2 + $0xe0] sm:$0xff] }
 0x2d0   : > { %v1930_v40 = vld [vmem:[#allocation2 + $0x58] sm:$0xff]  ;;  %2046 = vst [vmem:[%s3432_s1 + $0x28] sm:$0xff] %v2428_v53  ;;  %2047 = vst [vmem:[%s3432_s1 + $0x30] sm:$0xff] %v2429_v1  ;;  %v2432_v21 = vpack.c.bf16 %v1932_v34, %v1931_v3  ;;  %v1934_v38 = vld [vmem:[#allocation2 + $0x90] sm:$0xff] }
 0x2d1   : > { %v2431_v32 = vpack.c.bf16 %v1930_v40, %v1929_v56  ;;  %v1935_v28 = vld [vmem:[#allocation2 + $0x70] sm:$0xff]  ;;  %v1936_v37 = vld [vmem:[#allocation2 + $0xc0] sm:$0xff]  ;;  %2048 = vst [vmem:[%s3432_s1 + $0x38] sm:$0xff] %v2430_v54  ;;  %v2433_v30 = vpack.c.bf16 %v1934_v38, %v1933_v11  ;;  %v1937_v59 = vld [vmem:[#allocation2 + $0xa8] sm:$0xff] }
 0x2d2   : > { %v2434_v25 = vpack.c.bf16 %v1936_v37, %v1935_v28  ;;  %v1938_v36 = vld [vmem:[#allocation2 + $0xd0] sm:$0xff]  ;;  %2050 = vst [vmem:[%s3432_s1 + $0x48] sm:$0xff] %v2432_v21  ;;  %v1940_v26 = vld [vmem:[#allocation2 + $0x28] sm:$0xff]  ;;  %v1941_v7 = vld [vmem:[#allocation2 + $0xa0] sm:$0xff] }
 0x2d3   : > { %2049 = vst [vmem:[%s3432_s1 + $0x40] sm:$0xff] %v2431_v32  ;;  %v1939_v49 = vld [vmem:[#allocation2 + $0x10] sm:$0xff]  ;;  %v2435_v23 = vpack.c.bf16 %v1938_v36, %v1937_v59  ;;  %v1942_v45 = vld [vmem:[#allocation2 + $0xf8] sm:$0xff]  ;;  %2051 = vst [vmem:[%s3432_s1 + $0x50] sm:$0xff] %v2433_v30 }
 0x2d4   : > { %2052 = vst [vmem:[%s3432_s1 + $0x58] sm:$0xff] %v2434_v25  ;;  %v2436_v5 = vpack.c.bf16 %v1940_v26, %v1939_v49  ;;  %v2437_v50 = vpack.c.bf16 %v1942_v45, %v1941_v7  ;;  %v1943_v55 = vld [vmem:[#allocation2 + $0x20] sm:$0xff]  ;;  %v1944_v51 = vld [vmem:[#allocation2 + $0x98] sm:$0xff] }
 0x2d5   : > { %2053 = vst [vmem:[%s3432_s1 + $0x60] sm:$0xff] %v2435_v23  ;;  %v2438_v33 = vpack.c.bf16 %v1944_v51, %v1943_v55 }
 0x2d6   : > { %2054 = vst [vmem:[%s3432_s1 + $0x68] sm:$0xff] %v2436_v5  ;;  %2055 = vst [vmem:[%s3432_s1 + $0x70] sm:$0xff] %v2437_v50 }
 0x2d7   : > { %2056 = vst [vmem:[%s3432_s1 + $0x78] sm:$0xff] %v2438_v33 }
 0x2d8 PF: > { %s3970_s3 = sld [smem:[#allocation23_spill]]  ;;  %s2440_s21 = sshll.u32 %s3116_s23, 11 }
 0x2d9   : > { %s3971_s27 = sld [smem:[#allocation29_spill]]  ;;  %s2072_s5 = sshll.u32 %s3432_s1, 4  ;;  %s3832_s5 = int_to_ptr.vmem [resolvable:$true] %s2072_s5 }
 0x2da   : > { %s2058_s13 = scalar_lea.sflag [#allocation5], %s3402_s0  ;;  %s2992_s29 = scalar_lea.vmem %s3832_s5, 2048 }
 0x2db   : > { %p2993_p7 = scmp.ne.s32.totalorder %s3832_s5, %s2992_s29  ;;  %s3144_s15 = smov [#allocation9]  }
 0x2dc   : > { %s2996_s12 = sshll.u32 %s3144_s15, 4  ;;  %s2997_s12 = int_to_ptr.vmem [resolvable:$false] %s2996_s12 }
 0x2dd   : > { %s2998_s23 = scalar_lea.vmem %s2997_s12, 4096  ;;  %p2999_p4 = scmp.lt.s32.totalorder %s3832_s5, %s2997_s12 }
 0x2de   : > { %p3973_p5 = scmp.ne.s32.totalorder %s3970_s3, 0  ;;  %p3000_p11 = scmp.lt.s32.totalorder %s2998_s23, %s2992_s29 }
 0x2df   : > { %s3972_s8 = smov %s3971_s27  ;;  %s3829_s7 = scalar_lea.hbm %s3971_s27, %s2440_s21 }
 0x2e0   : > { %p2994_p0 = pnand %p2993_p7, %p3973_p5  ;;  %p3001_p6 = por %p3000_p11, %p2999_p4 }
 0x2e2   : > { %p2995_p8 = pneg %p2994_p0 }
 0x2e4   : > { %p3002_p10 = pnand %p3001_p6, %p2995_p8 }
 0x2e6   : > { %3005 = shalt.err (!%p3002_p10)
}
 0x2e7   : > { %s3006_s6 = scalar_lea.hbm %s3829_s7, 2048  ;;  %s3010_s30 = scalar_lea.hbm %s3972_s8, 4096 }
 0x2e8   : > { %p3007_p1 = scmp.ne.s32.totalorder %s3829_s7, %s3006_s6  ;;  %p3011_p9 = scmp.lt.s32.totalorder %s3829_s7, %s3972_s8 }
 0x2e9   : > { %p3012_p12 = scmp.lt.s32.totalorder %s3010_s30, %s3006_s6 }
 0x2ea   : > { %p3008_p3 = pnand %p3007_p1, %p3973_p5 }
 0x2eb   : > { %p3013_p2 = por %p3012_p12, %p3011_p9 }
 0x2ec   : > { %p3009_p13 = pneg %p3008_p3 }
 0x2ee   : > { %p3014_p7 = pnand %p3013_p2, %p3009_p13 }
 0x2f0   : > { %3017 = shalt.err (!%p3014_p7)
}
 0x2f1   : > { %s3145_s9 = smov 128   ;;  %s3146_s1 = smov 8  }
 0x2f2   : > { %2479 = dma.vmem_to_hbm [thread:$0]  (%p3973_p5), %s3832_s5, 2048, %s3829_s7, %s2058_s13, %s3145_s9, %s3145_s9, %s3146_s1  }
 0x2f3 PF: > { %s3974_s10 = sld [smem:[#allocation18_spill]] }
 0x2f4   : > { %s3975_s22 = sld [smem:[#allocation13_spill]] }
 0x2f5   : > { %s3976_s20 = sld [smem:[#allocation25_spill]] }
 0x2f9   : > { %p2496_p0 = scmp.ge.s32.totalorder %s3974_s10, 2 }
 0x2fa   : > { %s2087_s21 = sand.u32 1, %s3975_s22  }
 0x2fb   : > { %p3977_p8 = scmp.ne.s32.totalorder %s3976_s20, 0  ;;  %s2088_s4 = scalar_lea.sflag [#allocation5], %s2087_s21 }
 0x2fd   : > { %p2492_p4 = pnand %p2496_p0, %p3977_p8 }
 0x2ff   : > { %p2493_p11 = pneg %p2492_p4 }
 0x301   : > { %3079 = dma.done.wait (%p2493_p11), %s2088_s4, 2048  }
 0x302   : > { %3081 = vsyncadd (%p2493_p11), %s2088_s4, 4294965248  ;;  %s23_s27 = sadd.s32 1, %s3974_s10   ;;  %s3979_s0 = sld [smem:[#allocation22_spill]] }
 0x303   : > { %p3862_p6 = scmp.ge.s32.totalorder %s23_s27, 18   ;;  %s3980_s3 = sld [smem:[#allocation14_spill]] }
 0x304   : > { %s3981_s20 = sld [smem:[#allocation24_spill]]  ;;  %s3987_s15 = smov %s3088_s16 }
 0x305   : > { %s3982_s23 = sld [smem:[#allocation17_spill]]  ;;  %s3988_s16 = smov %s3092_s17 }
 0x306   : > { %s3983_s7 = sld [smem:[#allocation19_spill]]  ;;  %s3990_s18 = smov %s3100_s19 }
 0x307   : > { %s3984_s5 = sld [smem:[#allocation20_spill]]  ;;  %s3992_s21 = smov %s3120_s24 }
 0x308   : > { %s3985_s26 = sld [smem:[#allocation21_spill]]  ;;  %s3989_s17 = smov %s3979_s0 }
 0x309   : > { %s3991_s19 = smov %s3980_s3  ;;  %s3993_s22 = smov %s3124_s25 }
 0x30a   :  { %22 = sbr.rel (!%p3862_p6) target bundleno = 17 (0x11), region = 116 }
 0x30c   : > { %s3994_s24 = smov %s3983_s7 }
 0x30d   : > { %s3995_s25 = smov %s3984_s5 }
 0x30f   :  { %2093 = vsyncpa [#allocation4], 1 }
 0x310   :  { %2095 = vsyncpa [#allocation4 + $0x1], 1 }
 0x311   :  { %2096 = vsyncpa [#allocation7], 1 }
 0x312   :  { %2098 = vsyncpa [#allocation7 + $0x1], 1 }
 0x313   :  { %2099 = vsyncpa [#allocation5], 1 }
 0x314   :  { %2101 = vsyncpa [#allocation5 + $0x1], 1 }

</bundles_post_ra>
